<compile_context>
chip_gen: v7x
topology: tpu7x:2x2x1
jax: 0.10.0
libtpu: 0.0.40
codegen_flags: <defaults>
</compile_context>

<pallas_src>
import functools

import jax
import jax.numpy as jnp
import numpy as np
from jax.experimental import pallas as pl
from jax.experimental.pallas import tpu as pltpu


def mha_kernel(q_ref, k_ref, v_ref, wq_ref, bq_ref, wk_ref, wv_ref, wo_ref,
               out_ref, *, heads, d_k, d_v, bt, len_q, len_k):
    bf16 = jnp.bfloat16
    f32 = jnp.float32

    x = q_ref[...]                                  # (bt*Lq, D) f32
    residual = x                                    # residual.squeeze(2) is a no-op

    # LayerNorm statistics (eps=1e-5, PyTorch default), f32 on the VPU.
    # The affine (ln_w, ln_b) is folded into wq_ref / bq_ref in the wrapper.
    mean = jnp.mean(x, axis=-1, keepdims=True)
    var = jnp.mean((x - mean) ** 2, axis=-1, keepdims=True)
    x_norm = ((x - mean) * jax.lax.rsqrt(var + 1e-5)).astype(bf16)

    # Fat projections: one MXU matmul per tensor covering every batch row in
    # the block and every head at once.  Weights and k/v arrive pre-cast to
    # bf16 from the wrapper; accumulation is f32.
    qp = jnp.dot(x_norm, wq_ref[...], preferred_element_type=f32) + bq_ref[...]
    kp = jnp.dot(k_ref[...], wk_ref[...], preferred_element_type=f32)
    vp = jnp.dot(v_ref[...], wv_ref[...], preferred_element_type=f32)

    # Split the leading (row) dim back into (batch-in-block, seq) — last dim
    # unchanged and the split is 8-row aligned, so this is layout-free.
    qp = qp.reshape(bt, len_q, heads * d_k)
    kp = kp.reshape(bt, len_k, heads * d_k)
    vp = vp.reshape(bt, len_k, heads * d_v)

    # Per-head, batch-batched scores: one dot_general per head over all bt
    # batches (instead of bt*heads tiny 2-D dots), one lane slice per tensor
    # per head instead of per (batch, head).
    # TODO(synk): if `heads` or `bt` is ever scaled up, replace this static
    # unroll with a lax.fori_loop(unroll=True) / head-major relayout so vreg
    # live ranges stay bounded (only 64 vregs).
    scores = []
    v_heads = []
    for h in range(heads):
        q_h = qp[:, :, h * d_k:(h + 1) * d_k].astype(bf16)   # (bt, Lq, dk)
        k_h = kp[:, :, h * d_k:(h + 1) * d_k].astype(bf16)   # (bt, Lk, dk)
        v_heads.append(vp[:, :, h * d_v:(h + 1) * d_v].astype(bf16))
        scores.append(jnp.einsum('bqd,bkd->bqk', q_h, k_h,
                                 preferred_element_type=f32))  # (bt, Lq, Lk)

    # Softmax across the HEADS axis (F.softmax legacy default dim=1 for 4-D):
    # purely elementwise across the per-head score arrays.
    m = scores[0]
    for h in range(1, heads):
        m = jnp.maximum(m, scores[h])
    for h in range(heads):
        scores[h] = jnp.exp(scores[h] - m)          # overwrite: bounds live set
    denom = scores[0]
    for h in range(1, heads):
        denom = denom + scores[h]
    inv = pl.reciprocal(denom, approx=True)         # EUP slot, ~free

    # Attend per head (batched over batches), then assemble the (bt*Lq, H*dv)
    # slab in registers via a lane-axis concatenate — no VMEM scratch round
    # trip, no masked 32-lane partial stores.
    outs = []
    for h in range(heads):
        p_h = (scores[h] * inv).astype(bf16)
        outs.append(jnp.einsum('bqk,bkd->bqd', p_h, v_heads[h],
                               preferred_element_type=f32))    # (bt, Lq, dv)
    o = jnp.concatenate(outs, axis=-1).reshape(bt * len_q, heads * d_v)

    # Output projection for the whole batch block + residual: single fat
    # matmul, lane-dense (bt*Lq, D) store.
    out = jnp.dot(o.astype(bf16), wo_ref[...], preferred_element_type=f32)
    out_ref[...] = (out + residual).astype(out_ref.dtype)


def _default_batch_block(batch):
    """Generation-aware default: one fat grid step on single-TC v5e/v6e
    (maximizes matmul M, no per-step overhead); >=2 parallel steps on v7x so
    both TensorCores get work."""
    try:
        kind = jax.devices()[0].device_kind.lower()
    except Exception:
        kind = ""
    if "v7" in kind and batch >= 2:
        return max(1, batch // 2)
    return batch


def multihead_attention(q, k, v, wq, wk, wv, wo, ln_w, ln_b, *,
                        heads, d_k, d_v, batch_block=None):
    B, Lq, D = q.shape
    Lk = k.shape[1]

    if batch_block is None:
        batch_block = _default_batch_block(B)
    batch_block = int(min(max(batch_block, 1), B))

    def _legal(cand):
        # B must divide evenly; block sublane dims must be multiples of 8
        # unless the block covers the full array (always layout-legal).
        if B % cand != 0:
            return False
        if cand == B:
            return True
        return (cand * Lq) % 8 == 0 and (cand * Lk) % 8 == 0

    bt = batch_block
    while not _legal(bt):
        bt += 1
    num_blocks = B // bt

    # Flatten (B, L, D) -> (B*L, D): per-step blocks are lane/sublane-aligned
    # 2-D slabs and each projection is one fat (bt*L, D) @ (D, H*d) matmul.
    # k/v are only MXU operands -> cast to bf16 here (halves their HBM DMA);
    # q stays f32 (LayerNorm statistics + residual).
    q2 = q.reshape(B * Lq, D)
    k2 = k.reshape(B * Lk, D).astype(jnp.bfloat16)
    v2 = v.reshape(B * Lk, D).astype(jnp.bfloat16)

    # Fold the LayerNorm affine into wq:
    #   (x_norm * ln_w + ln_b) @ wq == x_norm @ (ln_w[:, None] * wq) + ln_b @ wq
    wq_f = (ln_w[:, None] * wq).astype(jnp.bfloat16)
    bq = (ln_b @ wq).reshape(1, heads * d_k).astype(jnp.float32)
    wk_b = wk.astype(jnp.bfloat16)
    wv_b = wv.astype(jnp.bfloat16)
    wo_b = wo.astype(jnp.bfloat16)

    kernel = functools.partial(mha_kernel, heads=heads, d_k=d_k, d_v=d_v,
                               bt=bt, len_q=Lq, len_k=Lk)

    # NOTE(v7x): for large L / d_model re-derive the VMEM budget for the
    # 64 MiB physical / ~32 MiB scoped limit: add an Lq-tiling grid axis, set
    # vmem_limit_bytes explicitly, and single-buffer the constant-index weight
    # blocks (pipeline_mode=pl.Buffered(1)).  At these shapes defaults are ample.
    grid_spec = pltpu.PrefetchScalarGridSpec(
        num_scalar_prefetch=0,
        grid=(num_blocks,),
        in_specs=[
            pl.BlockSpec((bt * Lq, D), lambda i: (i, 0)),
            pl.BlockSpec((bt * Lk, D), lambda i: (i, 0)),
            pl.BlockSpec((bt * Lk, D), lambda i: (i, 0)),
            pl.BlockSpec(wq_f.shape, lambda i: (0, 0)),
            pl.BlockSpec(bq.shape, lambda i: (0, 0)),
            pl.BlockSpec(wk_b.shape, lambda i: (0, 0)),
            pl.BlockSpec(wv_b.shape, lambda i: (0, 0)),
            pl.BlockSpec(wo_b.shape, lambda i: (0, 0)),
        ],
        out_specs=pl.BlockSpec((bt * Lq, D), lambda i: (i, 0)),
    )

    out2 = pl.pallas_call(
        kernel,
        # f32 output keeps the residual add exact (module dtype); switch to
        # bf16 here if downstream tolerates it to halve HBM writeback.
        out_shape=jax.ShapeDtypeStruct((B * Lq, D), jnp.float32),
        grid_spec=grid_spec,
        compiler_params=pltpu.CompilerParams(
            dimension_semantics=("parallel",)),
    )(q2, k2, v2, wq_f, bq, wk_b, wv_b, wo_b)

    out = out2.reshape(B, Lq, D)
    # softmax taken over the heads axis => score.sum(dim=1) == 1 everywhere;
    # return it analytically (no extra compute or HBM writeback).
    score_sum = jnp.ones((B, Lq, Lk), dtype=out.dtype)
    return out, score_sum


def reference(q, k, v, wq, wk, wv, wo, ln_w, ln_b, heads, d_k, d_v):
    """Pure-JAX f32 reference mirroring the PyTorch forward exactly."""
    B, Lq, _ = q.shape
    Lk = k.shape[1]
    residual = q
    mean = q.mean(-1, keepdims=True)
    var = ((q - mean) ** 2).mean(-1, keepdims=True)
    qn = (q - mean) / jnp.sqrt(var + 1e-5) * ln_w + ln_b
    qp = (qn @ wq).reshape(B, Lq, heads, d_k).transpose(0, 2, 1, 3)
    kp = (k @ wk).reshape(B, Lk, heads, d_k).transpose(0, 2, 1, 3)
    vp = (v @ wv).reshape(B, Lk, heads, d_v).transpose(0, 2, 1, 3)
    scores = jnp.einsum('bhqd,bhkd->bhqk', qp, kp)
    p = jax.nn.softmax(scores, axis=1)          # F.softmax legacy default dim=1 (heads)
    o = jnp.einsum('bhqk,bhkd->bhqd', p, vp)
    o = o.transpose(0, 2, 1, 3).reshape(B, Lq, heads * d_v)
    out = o @ wo + residual
    return out, p.sum(1)


if __name__ == "__main__":
    # Demo dims chosen lane-aligned: d_model and heads*d_k are multiples of 128
    # so every load/store is a full-lane (unmasked) access.
    B, L, d_model = 4, 8, 128
    heads, d_k, d_v = 4, 32, 32

    key = jax.random.PRNGKey(0)
    k_q, k_k, k_v, k_wq, k_wk, k_wv, k_wo, k_lw, k_lb = jax.random.split(key, 9)

    q = jax.random.normal(k_q, (B, L, d_model), dtype=jnp.float32)
    k = jax.random.normal(k_k, (B, L, d_model), dtype=jnp.float32)
    v = jax.random.normal(k_v, (B, L, d_model), dtype=jnp.float32)

    # Linear weights already transposed to (in, out); non-trivial LayerNorm
    # affine so the wrapper-side fold is actually exercised.
    wq = 0.03 * jax.random.normal(k_wq, (d_model, heads * d_k), dtype=jnp.float32)
    wk = 0.03 * jax.random.normal(k_wk, (d_model, heads * d_k), dtype=jnp.float32)
    wv = 0.03 * jax.random.normal(k_wv, (d_model, heads * d_v), dtype=jnp.float32)
    wo = 0.03 * jax.random.normal(k_wo, (heads * d_v, d_model), dtype=jnp.float32)
    ln_w = 1.0 + 0.05 * jax.random.normal(k_lw, (d_model,), dtype=jnp.float32)
    ln_b = 0.05 * jax.random.normal(k_lb, (d_model,), dtype=jnp.float32)

    out, score_sum = multihead_attention(
        q, k, v, wq, wk, wv, wo, ln_w, ln_b, heads=heads, d_k=d_k, d_v=d_v)
    jax.block_until_ready((out, score_sum))

    ref_out, ref_score = reference(q, k, v, wq, wk, wv, wo, ln_w, ln_b, heads, d_k, d_v)
    # bf16 MXU operands (f32 accumulation) -> compare at bf16-appropriate tolerance.
    np.testing.assert_allclose(np.asarray(out), np.asarray(ref_out), rtol=2e-2, atol=2e-2)
    np.testing.assert_allclose(np.asarray(score_sum), np.asarray(ref_score), rtol=1e-3, atol=1e-3)

    print("KERNEL_OK")
</pallas_src>

<mosaic_0001>
module attributes {stable_mosaic.version = 11 : i64} {
  func.func @mha_kernel(%arg0: i32, %arg1: memref<32x128xf32, #tpu.memory_space<vmem>>, %arg2: memref<32x128xbf16, #tpu.memory_space<vmem>>, %arg3: memref<32x128xbf16, #tpu.memory_space<vmem>>, %arg4: memref<128x128xbf16, #tpu.memory_space<vmem>>, %arg5: memref<1x128xf32, #tpu.memory_space<vmem>>, %arg6: memref<128x128xbf16, #tpu.memory_space<vmem>>, %arg7: memref<128x128xbf16, #tpu.memory_space<vmem>>, %arg8: memref<128x128xbf16, #tpu.memory_space<vmem>>, %arg9: memref<32x128xf32, #tpu.memory_space<vmem>>) attributes {dimension_semantics = [#tpu.dimension_semantics<parallel>], iteration_bounds = array<i64: 1>, scalar_prefetch = 0 : i64, scratch_operands = 0 : i64, tpu.core_type = #tpu.core_type<tc>, window_params = [{transform_indices = @transform_0, window_bounds = array<i64: 32, 128>}, {transform_indices = @transform_1, window_bounds = array<i64: 32, 128>}, {transform_indices = @transform_2, window_bounds = array<i64: 32, 128>}, {pipeline_mode = #tpu.pipeline_mode<synchronous>, transform_indices = @transform_3, window_bounds = array<i64: 128, 128>}, {pipeline_mode = #tpu.pipeline_mode<synchronous>, transform_indices = @transform_4, window_bounds = array<i64: 1, 128>}, {pipeline_mode = #tpu.pipeline_mode<synchronous>, transform_indices = @transform_5, window_bounds = array<i64: 128, 128>}, {pipeline_mode = #tpu.pipeline_mode<synchronous>, transform_indices = @transform_6, window_bounds = array<i64: 128, 128>}, {pipeline_mode = #tpu.pipeline_mode<synchronous>, transform_indices = @transform_7, window_bounds = array<i64: 128, 128>}, {transform_indices = @transform_8, window_bounds = array<i64: 32, 128>}]} {
    %c0 = arith.constant 0 : index
    %c0_0 = arith.constant 0 : index
    %0 = vector.load %arg1[%c0, %c0_0] : memref<32x128xf32, #tpu.memory_space<vmem>>, vector<32x128xf32>
    %cst = arith.constant dense<0.000000e+00> : vector<32xf32>
    %1 = vector.multi_reduction <add>, %0, %cst [1] : vector<32x128xf32> to vector<32xf32>
    %2 = vector.shape_cast %1 : vector<32xf32> to vector<32x1xf32>
    %cst_1 = arith.constant 1.280000e+02 : f32
    %3 = vector.broadcast %cst_1 : f32 to vector<32x1xf32>
    %4 = arith.divf %2, %3 : vector<32x1xf32>
    %5 = vector.broadcast %4 : vector<32x1xf32> to vector<32x128xf32>
    %6 = arith.subf %0, %5 : vector<32x128xf32>
    %7 = arith.mulf %6, %6 : vector<32x128xf32>
    %cst_2 = arith.constant dense<0.000000e+00> : vector<32xf32>
    %8 = vector.multi_reduction <add>, %7, %cst_2 [1] : vector<32x128xf32> to vector<32xf32>
    %9 = vector.shape_cast %8 : vector<32xf32> to vector<32x1xf32>
    %cst_3 = arith.constant 1.280000e+02 : f32
    %10 = vector.broadcast %cst_3 : f32 to vector<32x1xf32>
    %11 = arith.divf %9, %10 : vector<32x1xf32>
    %12 = vector.broadcast %4 : vector<32x1xf32> to vector<32x128xf32>
    %13 = arith.subf %0, %12 : vector<32x128xf32>
    %cst_4 = arith.constant 9.99999974E-6 : f32
    %14 = vector.broadcast %cst_4 : f32 to vector<32x1xf32>
    %15 = arith.addf %11, %14 : vector<32x1xf32>
    %16 = math.rsqrt %15 : vector<32x1xf32>
    %17 = vector.broadcast %16 : vector<32x1xf32> to vector<32x128xf32>
    %18 = arith.mulf %13, %17 : vector<32x128xf32>
    %19 = arith.truncf %18 : vector<32x128xf32> to vector<32x128xbf16>
    %c0_5 = arith.constant 0 : index
    %c0_6 = arith.constant 0 : index
    %20 = vector.load %arg4[%c0_5, %c0_6] : memref<128x128xbf16, #tpu.memory_space<vmem>>, vector<128x128xbf16>
    %cst_7 = arith.constant dense<0.000000e+00> : vector<32x128xf32>
    %21 = tpu.matmul %19, %20, %cst_7 {dimension_numbers = #tpu.dot_dimension_numbers<[1], [0], [0], [1], [0, 0, 1, 1], [], []>} : vector<32x128xbf16>, vector<128x128xbf16>, vector<32x128xf32> -> vector<32x128xf32>
    %c0_8 = arith.constant 0 : index
    %c0_9 = arith.constant 0 : index
    %22 = vector.load %arg5[%c0_8, %c0_9] : memref<1x128xf32, #tpu.memory_space<vmem>>, vector<1x128xf32>
    %23 = vector.broadcast %22 : vector<1x128xf32> to vector<32x128xf32>
    %24 = arith.addf %21, %23 : vector<32x128xf32>
    %c0_10 = arith.constant 0 : index
    %c0_11 = arith.constant 0 : index
    %25 = vector.load %arg2[%c0_10, %c0_11] : memref<32x128xbf16, #tpu.memory_space<vmem>>, vector<32x128xbf16>
    %c0_12 = arith.constant 0 : index
    %c0_13 = arith.constant 0 : index
    %26 = vector.load %arg6[%c0_12, %c0_13] : memref<128x128xbf16, #tpu.memory_space<vmem>>, vector<128x128xbf16>
    %cst_14 = arith.constant dense<0.000000e+00> : vector<32x128xf32>
    %27 = tpu.matmul %25, %26, %cst_14 {dimension_numbers = #tpu.dot_dimension_numbers<[1], [0], [0], [1], [0, 0, 1, 1], [], []>} : vector<32x128xbf16>, vector<128x128xbf16>, vector<32x128xf32> -> vector<32x128xf32>
    %c0_15 = arith.constant 0 : index
    %c0_16 = arith.constant 0 : index
    %28 = vector.load %arg3[%c0_15, %c0_16] : memref<32x128xbf16, #tpu.memory_space<vmem>>, vector<32x128xbf16>
    %c0_17 = arith.constant 0 : index
    %c0_18 = arith.constant 0 : index
    %29 = vector.load %arg7[%c0_17, %c0_18] : memref<128x128xbf16, #tpu.memory_space<vmem>>, vector<128x128xbf16>
    %cst_19 = arith.constant dense<0.000000e+00> : vector<32x128xf32>
    %30 = tpu.matmul %28, %29, %cst_19 {dimension_numbers = #tpu.dot_dimension_numbers<[1], [0], [0], [1], [0, 0, 1, 1], [], []>} : vector<32x128xbf16>, vector<128x128xbf16>, vector<32x128xf32> -> vector<32x128xf32>
    %31 = vector.shape_cast %24 : vector<32x128xf32> to vector<4x8x128xf32>
    %32 = vector.shape_cast %27 : vector<32x128xf32> to vector<4x8x128xf32>
    %33 = vector.shape_cast %30 : vector<32x128xf32> to vector<4x8x128xf32>
    %34 = vector.extract_strided_slice %31 {offsets = [0, 0, 0], sizes = [4, 8, 32], strides = [1, 1, 1]} : vector<4x8x128xf32> to vector<4x8x32xf32>
    %35 = arith.truncf %34 : vector<4x8x32xf32> to vector<4x8x32xbf16>
    %36 = vector.extract_strided_slice %32 {offsets = [0, 0, 0], sizes = [4, 8, 32], strides = [1, 1, 1]} : vector<4x8x128xf32> to vector<4x8x32xf32>
    %37 = arith.truncf %36 : vector<4x8x32xf32> to vector<4x8x32xbf16>
    %38 = vector.extract_strided_slice %33 {offsets = [0, 0, 0], sizes = [4, 8, 32], strides = [1, 1, 1]} : vector<4x8x128xf32> to vector<4x8x32xf32>
    %39 = arith.truncf %38 : vector<4x8x32xf32> to vector<4x8x32xbf16>
    "tpu.trace_start"() <{level = 10 : i32, message = "bqd,bkd->bqk"}> : () -> ()
    %cst_20 = arith.constant dense<0.000000e+00> : vector<4x8x8xf32>
    %40 = tpu.matmul %35, %37, %cst_20 {dimension_numbers = #tpu.dot_dimension_numbers<[2], [2], [1], [1], [0, 0, 0, 1, 1, 1], [0], [0]>} : vector<4x8x32xbf16>, vector<4x8x32xbf16>, vector<4x8x8xf32> -> vector<4x8x8xf32>
    "tpu.trace_stop"() : () -> ()
    %41 = vector.extract_strided_slice %31 {offsets = [0, 0, 32], sizes = [4, 8, 32], strides = [1, 1, 1]} : vector<4x8x128xf32> to vector<4x8x32xf32>
    %42 = arith.truncf %41 : vector<4x8x32xf32> to vector<4x8x32xbf16>
    %43 = vector.extract_strided_slice %32 {offsets = [0, 0, 32], sizes = [4, 8, 32], strides = [1, 1, 1]} : vector<4x8x128xf32> to vector<4x8x32xf32>
    %44 = arith.truncf %43 : vector<4x8x32xf32> to vector<4x8x32xbf16>
    %45 = vector.extract_strided_slice %33 {offsets = [0, 0, 32], sizes = [4, 8, 32], strides = [1, 1, 1]} : vector<4x8x128xf32> to vector<4x8x32xf32>
    %46 = arith.truncf %45 : vector<4x8x32xf32> to vector<4x8x32xbf16>
    "tpu.trace_start"() <{level = 10 : i32, message = "bqd,bkd->bqk"}> : () -> ()
    %cst_21 = arith.constant dense<0.000000e+00> : vector<4x8x8xf32>
    %47 = tpu.matmul %42, %44, %cst_21 {dimension_numbers = #tpu.dot_dimension_numbers<[2], [2], [1], [1], [0, 0, 0, 1, 1, 1], [0], [0]>} : vector<4x8x32xbf16>, vector<4x8x32xbf16>, vector<4x8x8xf32> -> vector<4x8x8xf32>
    "tpu.trace_stop"() : () -> ()
    %48 = vector.extract_strided_slice %31 {offsets = [0, 0, 64], sizes = [4, 8, 32], strides = [1, 1, 1]} : vector<4x8x128xf32> to vector<4x8x32xf32>
    %49 = arith.truncf %48 : vector<4x8x32xf32> to vector<4x8x32xbf16>
    %50 = vector.extract_strided_slice %32 {offsets = [0, 0, 64], sizes = [4, 8, 32], strides = [1, 1, 1]} : vector<4x8x128xf32> to vector<4x8x32xf32>
    %51 = arith.truncf %50 : vector<4x8x32xf32> to vector<4x8x32xbf16>
    %52 = vector.extract_strided_slice %33 {offsets = [0, 0, 64], sizes = [4, 8, 32], strides = [1, 1, 1]} : vector<4x8x128xf32> to vector<4x8x32xf32>
    %53 = arith.truncf %52 : vector<4x8x32xf32> to vector<4x8x32xbf16>
    "tpu.trace_start"() <{level = 10 : i32, message = "bqd,bkd->bqk"}> : () -> ()
    %cst_22 = arith.constant dense<0.000000e+00> : vector<4x8x8xf32>
    %54 = tpu.matmul %49, %51, %cst_22 {dimension_numbers = #tpu.dot_dimension_numbers<[2], [2], [1], [1], [0, 0, 0, 1, 1, 1], [0], [0]>} : vector<4x8x32xbf16>, vector<4x8x32xbf16>, vector<4x8x8xf32> -> vector<4x8x8xf32>
    "tpu.trace_stop"() : () -> ()
    %55 = vector.extract_strided_slice %31 {offsets = [0, 0, 96], sizes = [4, 8, 32], strides = [1, 1, 1]} : vector<4x8x128xf32> to vector<4x8x32xf32>
    %56 = arith.truncf %55 : vector<4x8x32xf32> to vector<4x8x32xbf16>
    %57 = vector.extract_strided_slice %32 {offsets = [0, 0, 96], sizes = [4, 8, 32], strides = [1, 1, 1]} : vector<4x8x128xf32> to vector<4x8x32xf32>
    %58 = arith.truncf %57 : vector<4x8x32xf32> to vector<4x8x32xbf16>
    %59 = vector.extract_strided_slice %33 {offsets = [0, 0, 96], sizes = [4, 8, 32], strides = [1, 1, 1]} : vector<4x8x128xf32> to vector<4x8x32xf32>
    %60 = arith.truncf %59 : vector<4x8x32xf32> to vector<4x8x32xbf16>
    "tpu.trace_start"() <{level = 10 : i32, message = "bqd,bkd->bqk"}> : () -> ()
    %cst_23 = arith.constant dense<0.000000e+00> : vector<4x8x8xf32>
    %61 = tpu.matmul %56, %58, %cst_23 {dimension_numbers = #tpu.dot_dimension_numbers<[2], [2], [1], [1], [0, 0, 0, 1, 1, 1], [0], [0]>} : vector<4x8x32xbf16>, vector<4x8x32xbf16>, vector<4x8x8xf32> -> vector<4x8x8xf32>
    "tpu.trace_stop"() : () -> ()
    %62 = arith.maximumf %40, %47 : vector<4x8x8xf32>
    %63 = arith.maximumf %62, %54 : vector<4x8x8xf32>
    %64 = arith.maximumf %63, %61 : vector<4x8x8xf32>
    %65 = arith.subf %40, %64 : vector<4x8x8xf32>
    %66 = math.exp %65 : vector<4x8x8xf32>
    %67 = arith.subf %47, %64 : vector<4x8x8xf32>
    %68 = math.exp %67 : vector<4x8x8xf32>
    %69 = arith.subf %54, %64 : vector<4x8x8xf32>
    %70 = math.exp %69 : vector<4x8x8xf32>
    %71 = arith.subf %61, %64 : vector<4x8x8xf32>
    %72 = math.exp %71 : vector<4x8x8xf32>
    %73 = arith.addf %66, %68 : vector<4x8x8xf32>
    %74 = arith.addf %73, %70 : vector<4x8x8xf32>
    %75 = arith.addf %74, %72 : vector<4x8x8xf32>
    %76 = tpu.reciprocal %75 {approx = true} : vector<4x8x8xf32> -> vector<4x8x8xf32>
    %77 = arith.mulf %66, %76 : vector<4x8x8xf32>
    %78 = arith.truncf %77 : vector<4x8x8xf32> to vector<4x8x8xbf16>
    "tpu.trace_start"() <{level = 10 : i32, message = "bqk,bkd->bqd"}> : () -> ()
    %cst_24 = arith.constant dense<0.000000e+00> : vector<4x8x32xf32>
    %79 = tpu.matmul %78, %39, %cst_24 {dimension_numbers = #tpu.dot_dimension_numbers<[2], [1], [1], [2], [0, 0, 0, 1, 1, 2], [0], [0]>} : vector<4x8x8xbf16>, vector<4x8x32xbf16>, vector<4x8x32xf32> -> vector<4x8x32xf32>
    "tpu.trace_stop"() : () -> ()
    %80 = arith.mulf %68, %76 : vector<4x8x8xf32>
    %81 = arith.truncf %80 : vector<4x8x8xf32> to vector<4x8x8xbf16>
    "tpu.trace_start"() <{level = 10 : i32, message = "bqk,bkd->bqd"}> : () -> ()
    %cst_25 = arith.constant dense<0.000000e+00> : vector<4x8x32xf32>
    %82 = tpu.matmul %81, %46, %cst_25 {dimension_numbers = #tpu.dot_dimension_numbers<[2], [1], [1], [2], [0, 0, 0, 1, 1, 2], [0], [0]>} : vector<4x8x8xbf16>, vector<4x8x32xbf16>, vector<4x8x32xf32> -> vector<4x8x32xf32>
    "tpu.trace_stop"() : () -> ()
    %83 = arith.mulf %70, %76 : vector<4x8x8xf32>
    %84 = arith.truncf %83 : vector<4x8x8xf32> to vector<4x8x8xbf16>
    "tpu.trace_start"() <{level = 10 : i32, message = "bqk,bkd->bqd"}> : () -> ()
    %cst_26 = arith.constant dense<0.000000e+00> : vector<4x8x32xf32>
    %85 = tpu.matmul %84, %53, %cst_26 {dimension_numbers = #tpu.dot_dimension_numbers<[2], [1], [1], [2], [0, 0, 0, 1, 1, 2], [0], [0]>} : vector<4x8x8xbf16>, vector<4x8x32xbf16>, vector<4x8x32xf32> -> vector<4x8x32xf32>
    "tpu.trace_stop"() : () -> ()
    %86 = arith.mulf %72, %76 : vector<4x8x8xf32>
    %87 = arith.truncf %86 : vector<4x8x8xf32> to vector<4x8x8xbf16>
    "tpu.trace_start"() <{level = 10 : i32, message = "bqk,bkd->bqd"}> : () -> ()
    %cst_27 = arith.constant dense<0.000000e+00> : vector<4x8x32xf32>
    %88 = tpu.matmul %87, %60, %cst_27 {dimension_numbers = #tpu.dot_dimension_numbers<[2], [1], [1], [2], [0, 0, 0, 1, 1, 2], [0], [0]>} : vector<4x8x8xbf16>, vector<4x8x32xbf16>, vector<4x8x32xf32> -> vector<4x8x32xf32>
    "tpu.trace_stop"() : () -> ()
    %89 = tpu.concatenate %79, %82, %85, %88 in 2 : vector<4x8x32xf32>, vector<4x8x32xf32>, vector<4x8x32xf32>, vector<4x8x32xf32> -> vector<4x8x128xf32>
    %90 = vector.shape_cast %89 : vector<4x8x128xf32> to vector<32x128xf32>
    %91 = arith.truncf %90 : vector<32x128xf32> to vector<32x128xbf16>
    %c0_28 = arith.constant 0 : index
    %c0_29 = arith.constant 0 : index
    %92 = vector.load %arg8[%c0_28, %c0_29] : memref<128x128xbf16, #tpu.memory_space<vmem>>, vector<128x128xbf16>
    %cst_30 = arith.constant dense<0.000000e+00> : vector<32x128xf32>
    %93 = tpu.matmul %91, %92, %cst_30 {dimension_numbers = #tpu.dot_dimension_numbers<[1], [0], [0], [1], [0, 0, 1, 1], [], []>} : vector<32x128xbf16>, vector<128x128xbf16>, vector<32x128xf32> -> vector<32x128xf32>
    %94 = arith.addf %93, %0 : vector<32x128xf32>
    %c0_31 = arith.constant 0 : index
    %c0_32 = arith.constant 0 : index
    %95 = vector.load %arg9[%c0_31, %c0_32] : memref<32x128xf32, #tpu.memory_space<vmem>>, vector<32x128xf32>
    tpu.vector_store %arg9[%c0_31, %c0_32], %94 {strides = array<i32>} : memref<32x128xf32, #tpu.memory_space<vmem>>, vector<32x128xf32>,
    return
  }
  func.func @transform_0(%arg0: i32) -> (i32, i32) {
    %c0_i32 = arith.constant 0 : i32
    %c0_i32_0 = arith.constant 0 : i32
    return %arg0, %c0_i32 : i32, i32
  }
  func.func @transform_1(%arg0: i32) -> (i32, i32) {
    %c0_i32 = arith.constant 0 : i32
    %c0_i32_0 = arith.constant 0 : i32
    return %arg0, %c0_i32 : i32, i32
  }
  func.func @transform_2(%arg0: i32) -> (i32, i32) {
    %c0_i32 = arith.constant 0 : i32
    %c0_i32_0 = arith.constant 0 : i32
    return %arg0, %c0_i32 : i32, i32
  }
  func.func @transform_3(%arg0: i32) -> (i32, i32) {
    %c0_i32 = arith.constant 0 : i32
    %c0_i32_0 = arith.constant 0 : i32
    %c0_i32_1 = arith.constant 0 : i32
    return %c0_i32, %c0_i32_0 : i32, i32
  }
  func.func @transform_4(%arg0: i32) -> (i32, i32) {
    %c0_i32 = arith.constant 0 : i32
    %c0_i32_0 = arith.constant 0 : i32
    %c0_i32_1 = arith.constant 0 : i32
    return %c0_i32, %c0_i32_0 : i32, i32
  }
  func.func @transform_5(%arg0: i32) -> (i32, i32) {
    %c0_i32 = arith.constant 0 : i32
    %c0_i32_0 = arith.constant 0 : i32
    %c0_i32_1 = arith.constant 0 : i32
    return %c0_i32, %c0_i32_0 : i32, i32
  }
  func.func @transform_6(%arg0: i32) -> (i32, i32) {
    %c0_i32 = arith.constant 0 : i32
    %c0_i32_0 = arith.constant 0 : i32
    %c0_i32_1 = arith.constant 0 : i32
    return %c0_i32, %c0_i32_0 : i32, i32
  }
  func.func @transform_7(%arg0: i32) -> (i32, i32) {
    %c0_i32 = arith.constant 0 : i32
    %c0_i32_0 = arith.constant 0 : i32
    %c0_i32_1 = arith.constant 0 : i32
    return %c0_i32, %c0_i32_0 : i32, i32
  }
  func.func @transform_8(%arg0: i32) -> (i32, i32) {
    %c0_i32 = arith.constant 0 : i32
    %c0_i32_0 = arith.constant 0 : i32
    return %arg0, %c0_i32 : i32, i32
  }
}

</mosaic_0001>

<bundles_post_ra>
// kernel: tpu_custom_call.1
= control target key start
LH: loop header
LB: loop body
LE: loop exit
PB: predicated region body
PF: predicated region fallthrough
CT: control target
= control target key end

     0   :  { %13 = vsyncpa [#allocation3], 0  ;;  %s3701_s0 = inlined_call_operand.hbm [shape: f32[32,128], index: 0, kind: input, shape index: {}]   ;;  %s3702_s1 = inlined_call_operand.hbm [shape: bf16[32,128], index: 1, kind: input, shape index: {}]   ;;  %s3703_s2 = inlined_call_operand.hbm [shape: bf16[32,128], index: 2, kind: input, shape index: {}]   ;;  %s3704_s3 = inlined_call_operand.hbm [shape: bf16[128,128], index: 3, kind: input, shape index: {}]   ;;  %s3705_s4 = inlined_call_operand.vmem [shape: f32[1,128], index: 4, kind: input, shape index: {}]   ;;  %s3706_s5 = inlined_call_operand.hbm [shape: bf16[128,128], index: 5, kind: input, shape index: {}]   ;;  %s3707_s6 = inlined_call_operand.hbm [shape: bf16[128,128], index: 6, kind: input, shape index: {}]   ;;  %s3708_s7 = inlined_call_operand.hbm [shape: bf16[128,128], index: 7, kind: input, shape index: {}]   ;;  %s3709_s8 = inlined_call_operand.hbm [shape: f32[32,128], index: 8, kind: output, shape index: {}]  }
   0x1   :  { %14 = vsyncpa [#allocation6], 0 }
   0x2   :  { %15 = vsyncpa [#allocation9], 0 }
   0x3   :  { %16 = vsyncpa [#allocation12], 0 }
   0x4   :  { %17 = vsyncpa [#allocation4], 0  ;;  %s3198_s27 = smov [#allocation5]   ;;  %s3012_s9 = scalar_lea.hbm %s3702_s1, 256 }
   0x5   :  { %s35_s28 = sshll.u32 %s3198_s27, 4  ;;  %p3013_p0 = scmp.ne.s32.totalorder %s3702_s1, %s3012_s9  ;;  %s36_s28 = int_to_ptr.vmem [resolvable:$true] %s35_s28 }
   0x6   :  { %p3016_p1 = scmp.lt.u32.totalorder %s3012_s9, %s3702_s1 }
   0x8   :  { %p3018_p2 = pnand %p3016_p1, %p3013_p0 }
   0xa   :  { %3021 = shalt.err (!%p3018_p2)
}
   0xb   :  { %s3022_s14 = scalar_lea.vmem %s36_s28, 256  ;;  %p3027_p4 = scmp.lt.s32.totalorder %s36_s28, %s36_s28 }
   0xc   :  { %p3023_p3 = scmp.ne.s32.totalorder %s36_s28, %s3022_s14  ;;  %p3028_p5 = scmp.lt.s32.totalorder %s3022_s14, %s3022_s14 }
   0xe   :  { %p3029_p6 = por %p3028_p5, %p3027_p4 }
  0x10   :  { %p3030_p7 = pnand %p3029_p6, %p3023_p3 }
  0x12   :  { %3033 = shalt.err (!%p3030_p7)
}
  0x13   :  { %s3199_s15 = smov 64   ;;  %s3200_s16 = smov 4  }
  0x14   :  { %41 = dma.hbm_to_vmem [thread:$0]  %s3702_s1, 256, %s36_s28, [#allocation6], %s3199_s15, %s3199_s15, %s3200_s16  }
  0x15   :  { %s3201_s19 = smov [#allocation8]   ;;  %s3202_s21 = smov [#allocation11]  }
  0x16   :  { %s59_s20 = sshll.u32 %s3201_s19, 4  ;;  %s85_s22 = sshll.u32 %s3202_s21, 4  ;;  %s60_s20 = int_to_ptr.vmem [resolvable:$true] %s59_s20  ;;  %s86_s22 = int_to_ptr.vmem [resolvable:$true] %s85_s22 }
  0x17   :  { %s3034_s25 = scalar_lea.hbm %s3704_s3, 1024 }
  0x18   :  { %p3035_p8 = scmp.ne.s32.totalorder %s3704_s3, %s3034_s25  ;;  %p3038_p9 = scmp.lt.u32.totalorder %s3034_s25, %s3704_s3 }
  0x1a   :  { %p3040_p10 = pnand %p3038_p9, %p3035_p8 }
  0x1c   :  { %3043 = shalt.err (!%p3040_p10)
}
  0x1d   :  { %s3044_s1 = scalar_lea.vmem %s60_s20, 1024  ;;  %p3049_p12 = scmp.lt.s32.totalorder %s60_s20, %s60_s20 }
  0x1e   :  { %p3045_p11 = scmp.ne.s32.totalorder %s60_s20, %s3044_s1  ;;  %p3050_p13 = scmp.lt.s32.totalorder %s3044_s1, %s3044_s1 }
  0x20   :  { %p3051_p0 = por %p3050_p13, %p3049_p12 }
  0x22   :  { %p3052_p1 = pnand %p3051_p0, %p3045_p11 }
  0x24   :  { %3055 = shalt.err (!%p3052_p1)
}
  0x25   :  { %65 = dma.hbm_to_vmem [thread:$0]  %s3704_s3, 1024, %s60_s20, [#allocation9], %s3199_s15, %s3199_s15, %s3200_s16  }
  0x26   :  { %s3056_s12 = scalar_lea.hbm %s3707_s6, 1024 }
  0x27   :  { %p3057_p2 = scmp.ne.s32.totalorder %s3707_s6, %s3056_s12  ;;  %p3060_p3 = scmp.lt.u32.totalorder %s3056_s12, %s3707_s6 }
  0x29   :  { %p3062_p4 = pnand %p3060_p3, %p3057_p2 }
  0x2b   :  { %3065 = shalt.err (!%p3062_p4)
}
  0x2c   :  { %s3066_s19 = scalar_lea.vmem %s86_s22, 1024  ;;  %p3071_p6 = scmp.lt.s32.totalorder %s86_s22, %s86_s22 }
  0x2d   :  { %p3067_p5 = scmp.ne.s32.totalorder %s86_s22, %s3066_s19  ;;  %p3072_p7 = scmp.lt.s32.totalorder %s3066_s19, %s3066_s19 }
  0x2f   :  { %p3073_p8 = por %p3072_p7, %p3071_p6 }
  0x31   :  { %p3074_p9 = pnand %p3073_p8, %p3067_p5 }
  0x33   :  { %3077 = shalt.err (!%p3074_p9)
}
  0x34   :  { %91 = dma.hbm_to_vmem [thread:$0]  %s3707_s6, 1024, %s86_s22, [#allocation12], %s3199_s15, %s3199_s15, %s3200_s16  }
  0x35   :  { %s3203_s21 = smov [#allocation2]   ;;  %s3078_s26 = scalar_lea.hbm %s3701_s0, 512 }
  0x36   :  { %s23_s23 = sshll.u32 %s3203_s21, 4  ;;  %p3079_p10 = scmp.ne.s32.totalorder %s3701_s0, %s3078_s26  ;;  %s24_s23 = int_to_ptr.vmem [resolvable:$true] %s23_s23 }
  0x37   :  { %p3082_p11 = scmp.lt.u32.totalorder %s3078_s26, %s3701_s0 }
  0x39   :  { %p3084_p12 = pnand %p3082_p11, %p3079_p10 }
  0x3b   :  { %3087 = shalt.err (!%p3084_p12)
}
  0x3c   :  { %s3088_s28 = scalar_lea.vmem %s24_s23, 512  ;;  %p3093_p0 = scmp.lt.s32.totalorder %s24_s23, %s24_s23 }
  0x3d   :  { %p3089_p13 = scmp.ne.s32.totalorder %s24_s23, %s3088_s28  ;;  %p3094_p1 = scmp.lt.s32.totalorder %s3088_s28, %s3088_s28 }
  0x3f   :  { %p3095_p2 = por %p3094_p1, %p3093_p0 }
  0x41   :  { %p3096_p3 = pnand %p3095_p2, %p3089_p13 }
  0x43   :  { %3099 = shalt.err (!%p3096_p3)
}
  0x44   :  { %s3204_s6 = smov 128   ;;  %s3205_s22 = smov 8  }
  0x45   :  { %29 = dma.hbm_to_vmem [thread:$0]  %s3701_s0, 512, %s24_s23, [#allocation3], %s3204_s6, %s3204_s6, %s3205_s22  }
  0x46   :  { %s3206_s11 = smov [#allocation7]   ;;  %s3207_s13 = smov [#allocation10]  }
  0x47   :  { %s47_s12 = sshll.u32 %s3206_s11, 4  ;;  %s73_s14 = sshll.u32 %s3207_s13, 4  ;;  %s48_s12 = int_to_ptr.vmem [resolvable:$true] %s47_s12  ;;  %s3319_s14 = int_to_ptr.vmem [resolvable:$true] %s73_s14 }
  0x48   :  { %s3100_s19 = scalar_lea.hbm %s3703_s2, 256 }
  0x49   :  { %p3101_p4 = scmp.ne.s32.totalorder %s3703_s2, %s3100_s19  ;;  %p3104_p5 = scmp.lt.u32.totalorder %s3100_s19, %s3703_s2 }
  0x4b   :  { %p3106_p6 = pnand %p3104_p5, %p3101_p4 }
  0x4d   :  { %3109 = shalt.err (!%p3106_p6)
}
  0x4e   :  { %s3110_s0 = scalar_lea.vmem %s48_s12, 256  ;;  %p3115_p8 = scmp.lt.s32.totalorder %s48_s12, %s48_s12 }
  0x4f   :  { %p3111_p7 = scmp.ne.s32.totalorder %s48_s12, %s3110_s0  ;;  %p3116_p9 = scmp.lt.s32.totalorder %s3110_s0, %s3110_s0 }
  0x51   :  { %p3117_p10 = por %p3116_p9, %p3115_p8 }
  0x53   :  { %p3118_p11 = pnand %p3117_p10, %p3111_p7 }
  0x55   :  { %3121 = shalt.err (!%p3118_p11)
}
  0x56   :  { %53 = dma.hbm_to_vmem [thread:$0]  %s3703_s2, 256, %s48_s12, [#allocation6], %s3199_s15, %s3199_s15, %s3200_s16  }
  0x57   :  { %s3122_s29 = scalar_lea.hbm %s3706_s5, 1024 }
  0x58   :  { %p3123_p12 = scmp.ne.s32.totalorder %s3706_s5, %s3122_s29  ;;  %p3126_p13 = scmp.lt.u32.totalorder %s3122_s29, %s3706_s5 }
  0x5a   :  { %p3128_p0 = pnand %p3126_p13, %p3123_p12 }
  0x5c   :  { %3131 = shalt.err (!%p3128_p0)
}
  0x5d   :  { %s3132_s10 = scalar_lea.vmem %s3319_s14, 1024  ;;  %p3137_p2 = scmp.lt.s32.totalorder %s3319_s14, %s3319_s14 }
  0x5e   :  { %p3133_p1 = scmp.ne.s32.totalorder %s3319_s14, %s3132_s10  ;;  %p3138_p3 = scmp.lt.s32.totalorder %s3132_s10, %s3132_s10 }
  0x60   :  { %p3139_p4 = por %p3138_p3, %p3137_p2 }
  0x62   :  { %p3140_p5 = pnand %p3139_p4, %p3133_p1 }
  0x64   :  { %3143 = shalt.err (!%p3140_p5)
}
  0x65   :  { %79 = dma.hbm_to_vmem [thread:$0]  %s3706_s5, 1024, %s3319_s14, [#allocation9], %s3199_s15, %s3199_s15, %s3200_s16  }
  0x66   :  { %s3208_s12 = smov [#allocation13]   ;;  %s3144_s19 = scalar_lea.hbm %s3708_s7, 1024 }
  0x67   :  { %s97_s13 = sshll.u32 %s3208_s12, 4  ;;  %p3145_p6 = scmp.ne.s32.totalorder %s3708_s7, %s3144_s19  ;;  %s98_s13 = int_to_ptr.vmem [resolvable:$true] %s97_s13 }
  0x68   :  { %p3148_p7 = scmp.lt.u32.totalorder %s3144_s19, %s3708_s7 }
  0x6a   :  { %p3150_p8 = pnand %p3148_p7, %p3145_p6 }
  0x6c   :  { %3153 = shalt.err (!%p3150_p8)
}
  0x6d   :  { %s3154_s0 = scalar_lea.vmem %s98_s13, 1024  ;;  %p3159_p10 = scmp.lt.s32.totalorder %s98_s13, %s98_s13 }
  0x6e   :  { %p3155_p9 = scmp.ne.s32.totalorder %s98_s13, %s3154_s0  ;;  %p3160_p11 = scmp.lt.s32.totalorder %s3154_s0, %s3154_s0 }
  0x70   :  { %p3161_p12 = por %p3160_p11, %p3159_p10 }
  0x72   :  { %p3162_p13 = pnand %p3161_p12, %p3155_p9 }
  0x74   :  { %3165 = shalt.err (!%p3162_p13)
}
  0x75   :  { %103 = dma.hbm_to_vmem [thread:$0]  %s3708_s7, 1024, %s98_s13, [#allocation12], %s3199_s15, %s3199_s15, %s3200_s16  }
  0x76   :  { %3188 = dma.done.wait [#allocation3], 512  }
  0x77   :  { %3189 = vsyncadd [#allocation3], 4294966784 }
  0x78   :  { %3190 = dma.done.wait [#allocation6], 512  }
  0x79   :  { %3191 = vsyncadd [#allocation6], 4294966784 }
  0x7a   :  { %3192 = dma.done.wait [#allocation9], 2048  }
  0x7b   :  { %3193 = vsyncadd [#allocation9], 4294965248 }
  0x7c   :  { %3194 = dma.done.wait [#allocation12], 2048  }
  0x7d   :  { %3195 = vsyncadd [#allocation12], 4294965248  ;;  %v128_v0 = vld [vmem:[#allocation2 + $0x10] sm:$0xff]  ;;  %v129_v1 = vld [vmem:[#allocation2 + $0x18] sm:$0xff]  ;;  %v3209_v28 = vmov 0.0   ;;  %vm567_vm0 = vcmask 261120  }
  0x7e   :  { %134 = vadd.xlane.f32.xlu0 %v128_v0  ;;  %v2926_v2 = vld [vmem:[#allocation10] sm:$0xff]   ;;  %v2927_v3 = vld [vmem:[#allocation10 + $0x8] sm:$0xff]   ;;  %v2928_v6 = vld [vmem:[#allocation10 + $0x10] sm:$0xff]   ;;  %s3210_s7 = smov 96   ;;  %vm3211_vm1 = vmmov 0   ;;  %vm1448_vm2 = vcmask 1043456  }
  0x7f   :  { %v2931_v4 = vld [vmem:[#allocation8] sm:$0xff]   ;;  %2628 = vmatprep.subr.bf16.mxu1 %v2926_v2  ;;  %v2933_v5 = vld [vmem:[#allocation8 + $0x8] sm:$0xff]   ;;  %v2935_v7 = vld [vmem:[#allocation8 + $0x10] sm:$0xff]   ;;  %vm1444_vm3 = vcmask 64512   ;;  %vm2286_vm4 = vcmask 523264   ;;  %vm2291_vm5 = vcmask 785408  }
  0x80   :  { %2629 = vmatpush3.bf16.msra.mxu1 %v2926_v2  ;;  %2608 = vmatprep.subr.bf16.mxu0 %v2931_v4  ;;  %v2929_v8 = vld [vmem:[#allocation10 + $0x18] sm:$0xff]   ;;  %v2930_v9 = vld [vmem:[#allocation10 + $0x20] sm:$0xff]   ;;  %v2932_v10 = vld [vmem:[#allocation10 + $0x28] sm:$0xff]  }
  0x81   :  { %2630 = vmatprep.subr.bf16.mxu1 %v2927_v3  ;;  %2609 = vmatpush3.bf16.msra.mxu0 %v2931_v4  ;;  %v2934_v11 = vld [vmem:[#allocation10 + $0x30] sm:$0xff]   ;;  %v2936_v20 = vld [vmem:[#allocation10 + $0x38] sm:$0xff]   ;;  %v2938_v22 = vld [vmem:[#allocation5] sm:$0xff]  }
  0x82   :  { %136 = vadd.xlane.f32.xlu0 %v129_v1  ;;  %2610 = vmatprep.subr.bf16.mxu0 %v2933_v5  ;;  %v2937_v21 = vld [vmem:[#allocation8 + $0x18] sm:$0xff]   ;;  %v2939_v23 = vld [vmem:[#allocation5 + $0x8] sm:$0xff]   ;;  %v2940_v24 = vld [vmem:[#allocation8 + $0x20] sm:$0xff]  }
  0x83   :  { %2644 = vmatprep.mubr.bf16.mxu1 %v2938_v22  ;;  %v2941_v25 = vld [vmem:[#allocation8 + $0x28] sm:$0xff]   ;;  %v2942_v26 = vld [vmem:[#allocation8 + $0x30] sm:$0xff]   ;;  %v2943_v27 = vld [vmem:[#allocation8 + $0x38] sm:$0xff]  }
  0x84   :  { %2631 = vmatpush3.bf16.msra.mxu1 %v2927_v3  ;;  %v2944_v48 = vld [vmem:[#allocation11] sm:$0xff]   ;;  %v2945_v49 = vld [vmem:[#allocation11 + $0x8] sm:$0xff]   ;;  %v2946_v50 = vld [vmem:[#allocation11 + $0x10] sm:$0xff]  }
  0x85   :  { %2632 = vmatprep.subr.bf16.mxu1 %v2928_v6  ;;  %2611 = vmatpush3.bf16.msra.mxu0 %v2933_v5  ;;  %v2947_v51 = vld [vmem:[#allocation11 + $0x18] sm:$0xff]   ;;  %v2948_v52 = vld [vmem:[#allocation11 + $0x20] sm:$0xff]   ;;  %v2949_v53 = vld [vmem:[#allocation11 + $0x28] sm:$0xff]  }
  0x86   :  { %2612 = vmatprep.subr.bf16.mxu0 %v2935_v7  ;;  %v2952_v54 = vld [vmem:[#allocation7] sm:$0xff]   ;;  %v2951_v56 = vld [vmem:[#allocation11 + $0x38] sm:$0xff]   ;;  %v2435_v63 = vld [vmem:[%s3705_s4] ss:$0 sm:$0xff]  ;;  %s3212_s4 = smov 32  }
  0x87   :  { %v2950_v55 = vld [vmem:[#allocation11 + $0x30] sm:$0xff]   ;;  %v2953_v57 = vld [vmem:[#allocation7 + $0x8] sm:$0xff]  }
  0x88   :  { %2633 = vmatpush3.bf16.msra.mxu1 %v2928_v6 }
  0x89   :  { %2634 = vmatprep.subr.bf16.mxu1 %v2929_v8  ;;  %2613 = vmatpush3.bf16.msra.mxu0 %v2935_v7 }
  0x8a   :  { %2614 = vmatprep.subr.bf16.mxu0 %v2937_v21 }
  0x8c   :  { %2635 = vmatpush3.bf16.msra.mxu1 %v2929_v8 }
  0x8d   :  { %2636 = vmatprep.subr.bf16.mxu1 %v2930_v9  ;;  %2615 = vmatpush3.bf16.msra.mxu0 %v2937_v21 }
  0x8e   :  { %2616 = vmatprep.subr.bf16.mxu0 %v2940_v24 }
  0x90   :  { %2637 = vmatpush3.bf16.msra.mxu1 %v2930_v9 }
  0x91   :  { %2638 = vmatprep.subr.bf16.mxu1 %v2932_v10  ;;  %2617 = vmatpush3.bf16.msra.mxu0 %v2940_v24 }
  0x92   :  { %2618 = vmatprep.subr.bf16.mxu0 %v2941_v25 }
  0x94   :  { %2639 = vmatpush3.bf16.msra.mxu1 %v2932_v10 }
  0x95   :  { %2640 = vmatprep.subr.bf16.mxu1 %v2934_v11  ;;  %2619 = vmatpush3.bf16.msra.mxu0 %v2941_v25 }
  0x96   :  { %2620 = vmatprep.subr.bf16.mxu0 %v2942_v26 }
  0x98   :  { %2641 = vmatpush3.bf16.msra.mxu1 %v2934_v11 }
  0x99   :  { %2642 = vmatprep.subr.bf16.mxu1 %v2936_v20  ;;  %2621 = vmatpush3.bf16.msra.mxu0 %v2942_v26 }
  0x9a   :  { %2622 = vmatprep.subr.bf16.mxu0 %v2943_v27 }
  0x9c   :  { %2643 = vmatpush3.bf16.msra.mxu1 %v2936_v20 }
  0x9d   :  { %2623 = vmatpush3.bf16.msra.mxu0 %v2943_v27  ;;  %2668 = vmatprep.subr.bf16.mxu1 %v3209_v28 }
  0x9e   :  { %2648 = vmatprep.subr.bf16.mxu0 %v2944_v48 }
  0x9f   :  { %2645 = vmatmul.mubr.bf16.vlgmr.msra.gmra.mrb[0].mxu1 %v2939_v23 }
  0xa0   :  { %2670 = vmatprep.mubr.msk.bf16.mxu1 %vm3211_vm1, %v3209_v28 }
 0x10b   :  { %v135_v12 = vpop.xlane.xlu0 %134 }
 0x10c   :  { %v141_v13 = vmul.f32 0.0078125, %v135_v12 }
 0x10e   :  { %v145_v14 = vsub.f32 %v128_v0, %v141_v13 }
 0x10f   :  { %v137_v15 = vpop.xlane.xlu0 %136 }
 0x110   :  { %v142_v16 = vmul.f32 0.0078125, %v137_v15  ;;  %v149_v17 = vmul.f32 %v145_v14, %v145_v14 }
 0x112   :  { %v146_v18 = vsub.f32 %v129_v1, %v142_v16  ;;  %155 = vadd.xlane.f32.xlu1 %v149_v17 }
 0x114   :  { %v150_v19 = vmul.f32 %v146_v18, %v146_v18 }
 0x116   :  { %157 = vadd.xlane.f32.xlu1 %v150_v19 }
 0x172   :  { %v2646_v40 = vpop.f32.mrb[0].mxu1 }
 0x173   :  { %v411_v41 = vpop.f32.mrb[1].mxu1  ;;  %v3374_v45 = vpack.c.bf16 %v2646_v40, %v2646_v40 }
 0x174   :  { %v3372_v42 = vpack.c.bf16 %v411_v41, %v411_v41  ;;  %v2647_v43 = vpop.f32.mrb[2].mxu1 }
 0x175   :  { %v414_v44 = vpop.f32.mrb[3].mxu1  ;;  %v3383_v47 = vpack.c.bf16 %v2647_v43, %v2647_v43  ;;  %v664_v12 = vsel %vm567_vm0, %v3374_v45, 0 }
 0x176   :  { %756 = vrot.lane.b32.xlu0 %v3372_v42, %s3210_s7  ;;  %v572_v46 = vsel %vm567_vm0, %v3372_v42, 0  ;;  %v560_v4 = vpack.c.bf16 %v414_v44, %v414_v44 }
 0x177   :  { %2669 = vmatpush3.bf16.xpose.msra.mxu1 %v572_v46  ;;  %v710_v15 = vsel %vm567_vm0, %v3383_v47, 0 }
 0x178   :  { %2674 = vmatprep.subr.bf16.mxu1 %v3209_v28  ;;  %v618_v7 = vsel %vm567_vm0, %v560_v4, 0 }
 0x17a   :  { %860 = vrot.lane.b32.xlu0 %v3374_v45, %s3210_s7 }
 0x17e   :  { %912 = vrot.lane.b32.xlu0 %v3383_v47, %s3210_s7 }
 0x182   :  { %962 = vrot.lane.b32.xlu0 %v3372_v42, %s3199_s15 }
 0x19f   :  { %v156_v29 = vpop.xlane.xlu1 %155 }
 0x1a0   :  { %v161_v30 = vmul.f32 0.0078125, %v156_v29 }
 0x1a2   :  { %v165_v31 = vadd.f32 1e-05, %v161_v30 }
 0x1a3   :  { %v158_v32 = vpop.xlane.xlu1 %157 }
 0x1a4   :  { %v162_v33 = vmul.f32 0.0078125, %v158_v32  ;;  %2962 = vrsqrt.f32 %v165_v31 }
 0x1a6   :  { %v166_v34 = vadd.f32 1e-05, %v162_v33 }
 0x1a8   :  { %2964 = vrsqrt.f32 %v166_v34 }
 0x1ae   :  { %v2963_v35 = vpop.eup %2962 }
 0x1af   :  { %v173_v37 = vmul.f32 %v2963_v35, %v145_v14 }
 0x1b2   :  { %v2965_v36 = vpop.eup %2964 }
 0x1b3   :  { %v174_v38 = vmul.f32 %v2965_v36, %v146_v18 }
 0x1b5   :  { %v176_v39 = vpack.c.bf16 %v174_v38, %v173_v37 }
 0x1b7   :  { %2625 = vmatmul.mubr.bf16.vlgmr.msra.gmra.mrb[0].mxu0 %v176_v39 }
 0x1b8   :  { %2649 = vmatpush3.bf16.msra.mxu0 %v2944_v48  ;;  %2664 = vmatprep.mubr.bf16.mxu0 %v2952_v54 }
 0x1b9   :  { %2650 = vmatprep.subr.bf16.mxu0 %v2945_v49 }
 0x1bc   :  { %2651 = vmatpush3.bf16.msra.mxu0 %v2945_v49 }
 0x1bd   :  { %2652 = vmatprep.subr.bf16.mxu0 %v2946_v50 }
 0x1c0   :  { %2653 = vmatpush3.bf16.msra.mxu0 %v2946_v50 }
 0x1c1   :  { %2654 = vmatprep.subr.bf16.mxu0 %v2947_v51 }
 0x1c4   :  { %2655 = vmatpush3.bf16.msra.mxu0 %v2947_v51 }
 0x1c5   :  { %2656 = vmatprep.subr.bf16.mxu0 %v2948_v52 }
 0x1c8   :  { %2657 = vmatpush3.bf16.msra.mxu0 %v2948_v52 }
 0x1c9   :  { %2658 = vmatprep.subr.bf16.mxu0 %v2949_v53 }
 0x1cc   :  { %2659 = vmatpush3.bf16.msra.mxu0 %v2949_v53 }
 0x1cd   :  { %2660 = vmatprep.subr.bf16.mxu0 %v2950_v55 }
 0x1d0   :  { %2661 = vmatpush3.bf16.msra.mxu0 %v2950_v55 }
 0x1d1   :  { %2662 = vmatprep.subr.bf16.mxu0 %v2951_v56 }
 0x1d4   :  { %2663 = vmatpush3.bf16.msra.mxu0 %v2951_v56 }
 0x1d5   :  { %2716 = vmatprep.subr.bf16.mxu0 %v3209_v28 }
 0x1d7   :  { %2665 = vmatmul.mubr.bf16.vlgmr.msra.gmra.mrb[4].mxu0 %v2953_v57 }
 0x1d8   :  { %2718 = vmatprep.mubr.msk.bf16.mxu0 %vm3211_vm1, %v3209_v28 }
 0x1e8   :  { %v757_v58 = vpop.permute.xlu0 %756 }
 0x1e9   :  { %v762_v16 = vsel %vm567_vm0, %v757_v58, 0 }
 0x1ec   :  { %v3394_v59 = vpop.permute.xlu0 %860 }
 0x1ed   :  { %v866_v27 = vsel %vm567_vm0, %v3394_v59, 0 }
 0x1f0   :  { %v3396_v60 = vpop.permute.xlu0 %912 }
 0x1f1   :  { %v918_v34 = vsel %vm567_vm0, %v3396_v60, 0 }
 0x1f4   :  { %v963_v61 = vpop.permute.xlu0 %962 }
 0x1f5   :  { %v968_v62 = vsel %vm567_vm0, %v963_v61, 0 }
 0x1f6   :  { %2717 = vmatpush3.bf16.xpose.msra.mxu0 %v968_v62 }
 0x1f7   :  { %2728 = vmatprep.subr.bf16.mxu0 %v3209_v28 }
 0x28a   :  { %v2626_v0 = vpop.f32.mrb[0].mxu0 }
 0x28b   :  { %v282_v1 = vpop.f32.mrb[1].mxu0  ;;  %v291_v8 = vadd.f32 %v2626_v0, %v2435_v63 }
 0x28c   :  { %v283_v2 = vadd.f32 %v2435_v63, %v282_v1  ;;  %v2627_v3 = vpop.f32.mrb[2].mxu0 }
 0x28d   :  { %v285_v5 = vpop.f32.mrb[3].mxu0  ;;  %v557_v10 = vpack.c.bf16 %v291_v8, %v291_v8  ;;  %v294_v13 = vadd.f32 %v2627_v3, %v2435_v63 }
 0x28e   :  { %v555_v6 = vpack.c.bf16 %v283_v2, %v283_v2  ;;  %v286_v9 = vadd.f32 %v2435_v63, %v285_v5 }
 0x28f   :  { %v558_v14 = vpack.c.bf16 %v294_v13, %v294_v13 }
 0x290   :  { %960 = vrot.lane.b32.xlu0 %v555_v6, %s3199_s15  ;;  %753 = vrot.lane.b32.xlu1 %v555_v6, %s3210_s7  ;;  %v556_v11 = vpack.c.bf16 %v286_v9, %v286_v9 }
 0x291   :  { %2671 = vmatmul.mubr.msk.bf16.vlgmr.msra.gmra.mrb[4].mxu1 %vm567_vm0, %v555_v6 }
 0x292   :  { %2675 = vmatpush3.bf16.xpose.msra.mxu1 %v618_v7  ;;  %2676 = vmatprep.mubr.msk.bf16.mxu1 %vm3211_vm1, %v3209_v28 }
 0x293   :  { %2680 = vmatprep.subr.bf16.mxu1 %v3209_v28 }
 0x294   :  { %1062 = vrot.lane.b32.xlu0 %v3374_v45, %s3199_s15  ;;  %808 = vrot.lane.b32.xlu1 %v560_v4, %s3210_s7 }
 0x298   :  { %1060 = vrot.lane.b32.xlu0 %v557_v10, %s3199_s15  ;;  %805 = vrot.lane.b32.xlu1 %v556_v11, %s3210_s7 }
 0x299   :  { %2677 = vmatmul.mubr.msk.bf16.vlgmr.msra.gmra.mrb[8].mxu1 %vm567_vm0, %v556_v11 }
 0x29a   :  { %2681 = vmatpush3.bf16.xpose.msra.mxu1 %v664_v12  ;;  %2682 = vmatprep.mubr.msk.bf16.mxu1 %vm3211_vm1, %v3209_v28 }
 0x29b   :  { %2686 = vmatprep.subr.bf16.mxu1 %v3209_v28 }
 0x29c   :  { %1162 = vrot.lane.b32.xlu0 %v3372_v42, %s3212_s4  ;;  %857 = vrot.lane.b32.xlu1 %v557_v10, %s3210_s7 }
 0x2a0   :  { %1160 = vrot.lane.b32.xlu0 %v555_v6, %s3212_s4  ;;  %909 = vrot.lane.b32.xlu1 %v558_v14, %s3210_s7 }
 0x2a1   :  { %2683 = vmatmul.mubr.msk.bf16.vlgmr.msra.gmra.mrb[12].mxu1 %vm567_vm0, %v557_v10 }
 0x2a2   :  { %2687 = vmatpush3.bf16.xpose.msra.mxu1 %v710_v15  ;;  %2688 = vmatprep.mubr.msk.bf16.mxu1 %vm3211_vm1, %v3209_v28 }
 0x2a3   :  { %2692 = vmatprep.subr.bf16.mxu1 %v3209_v28 }
 0x2a4   :  { %1262 = vrot.lane.b32.xlu0 %v3374_v45, %s3212_s4  ;;  %1012 = vrot.lane.b32.xlu1 %v560_v4, %s3199_s15 }
 0x2a8   :  { %1260 = vrot.lane.b32.xlu0 %v557_v10, %s3212_s4  ;;  %1112 = vrot.lane.b32.xlu1 %v3383_v47, %s3199_s15 }
 0x2a9   :  { %2689 = vmatmul.mubr.msk.bf16.vlgmr.msra.gmra.mrb[16].mxu1 %vm567_vm0, %v558_v14 }
 0x2aa   :  { %2693 = vmatpush3.bf16.xpose.msra.mxu1 %v762_v16  ;;  %2694 = vmatprep.mubr.msk.bf16.mxu1 %vm3211_vm1, %v3209_v28  ;;  %v2666_v41 = vpop.f32.mrb[4].mxu0 }
 0x2ab   :  { %2698 = vmatprep.subr.bf16.mxu1 %v3209_v28  ;;  %v540_v42 = vpop.f32.mrb[5].mxu0  ;;  %v3495_v48 = vpack.c.bf16 %v2666_v41, %v2666_v41 }
 0x2ac   :  { %1010 = vrot.lane.b32.xlu1 %v556_v11, %s3199_s15  ;;  %v563_v44 = vpack.c.bf16 %v540_v42, %v540_v42  ;;  %v2667_v45 = vpop.f32.mrb[6].mxu0 }
 0x2ad   :  { %v3499_v51 = vpack.c.bf16 %v2667_v45, %v2667_v45 }
 0x2ae   :  { %1639 = vrot.lane.b32.xlu0 %v563_v44, %s3210_s7  ;;  %v1450_v50 = vsel %vm1448_vm2, %v563_v44, 0 }
 0x2b0   :  { %1110 = vrot.lane.b32.xlu1 %v558_v14, %s3199_s15 }
 0x2b2   :  { %1737 = vrot.lane.b32.xlu0 %v3495_v48, %s3210_s7 }
 0x2b4   :  { %1212 = vrot.lane.b32.xlu1 %v560_v4, %s3212_s4 }
 0x2b6   :  { %1842 = vrot.lane.b32.xlu0 %v563_v44, %s3199_s15 }
 0x2b8   :  { %1210 = vrot.lane.b32.xlu1 %v556_v11, %s3212_s4 }
 0x2ba   :  { %1938 = vrot.lane.b32.xlu0 %v3495_v48, %s3199_s15 }
 0x2bc   :  { %1312 = vrot.lane.b32.xlu1 %v3383_v47, %s3212_s4  ;;  %v543_v47 = vpop.f32.mrb[7].mxu0 }
 0x2bd   :  { %v564_v49 = vpack.c.bf16 %v543_v47, %v543_v47 }
 0x2be   :  { %2042 = vrot.lane.b32.xlu0 %v563_v44, %s3212_s4 }
 0x2bf   :  { %v1496_v56 = vsel %vm1448_vm2, %v564_v49, 0 }
 0x2c0   :  { %1310 = vrot.lane.b32.xlu1 %v558_v14, %s3212_s4 }
 0x2c2   :  { %2138 = vrot.lane.b32.xlu0 %v3495_v48, %s3212_s4 }
 0x2c4   :  { %1688 = vrot.lane.b32.xlu1 %v564_v49, %s3210_s7 }
 0x2c8   :  { %1786 = vrot.lane.b32.xlu1 %v3499_v51, %s3210_s7 }
 0x2cc   :  { %1890 = vrot.lane.b32.xlu1 %v564_v49, %s3199_s15 }
 0x2d0   :  { %1986 = vrot.lane.b32.xlu1 %v3499_v51, %s3199_s15 }
 0x2d4   :  { %2090 = vrot.lane.b32.xlu1 %v564_v49, %s3212_s4 }
 0x2d8   :  { %2186 = vrot.lane.b32.xlu1 %v3499_v51, %s3212_s4 }
 0x302   :  { %v754_v17 = vpop.permute.xlu1 %753  ;;  %v961_v18 = vpop.permute.xlu0 %960 }
 0x303   :  { %2695 = vmatmul.mubr.msk.bf16.vlgmr.msra.gmra.mrb[20].mxu1 %vm567_vm0, %v754_v17  ;;  %2719 = vmatmul.mubr.msk.bf16.vlgmr.msra.gmra.mrb[8].mxu0 %vm567_vm0, %v961_v18 }
 0x304   :  { %2700 = vmatprep.mubr.msk.bf16.mxu1 %vm3211_vm1, %v3209_v28  ;;  %2730 = vmatprep.mubr.msk.bf16.mxu0 %vm3211_vm1, %v3209_v28 }
 0x306   :  { %v809_v19 = vpop.permute.xlu1 %808  ;;  %v1063_v20 = vpop.permute.xlu0 %1062 }
 0x307   :  { %v814_v21 = vsel %vm567_vm0, %v809_v19, 0  ;;  %v1068_v22 = vsel %vm567_vm0, %v1063_v20, 0 }
 0x308   :  { %2699 = vmatpush3.bf16.xpose.msra.mxu1 %v814_v21  ;;  %2729 = vmatpush3.bf16.xpose.msra.mxu0 %v1068_v22 }
 0x309   :  { %2704 = vmatprep.subr.bf16.mxu1 %v3209_v28  ;;  %2740 = vmatprep.subr.bf16.mxu0 %v3209_v28 }
 0x30a   :  { %v806_v23 = vpop.permute.xlu1 %805  ;;  %v1061_v24 = vpop.permute.xlu0 %1060 }
 0x30e   :  { %v858_v25 = vpop.permute.xlu1 %857  ;;  %v1163_v26 = vpop.permute.xlu0 %1162 }
 0x30f   :  { %v1168_v29 = vsel %vm567_vm0, %v1163_v26, 0  ;;  %2701 = vmatmul.mubr.msk.bf16.vlgmr.msra.gmra.mrb[24].mxu1 %vm567_vm0, %v806_v23  ;;  %2731 = vmatmul.mubr.msk.bf16.vlgmr.msra.gmra.mrb[12].mxu0 %vm567_vm0, %v1061_v24 }
 0x310   :  { %2705 = vmatpush3.bf16.xpose.msra.mxu1 %v866_v27  ;;  %2741 = vmatpush3.bf16.xpose.msra.mxu0 %v1168_v29 }
 0x311   :  { %2706 = vmatprep.mubr.msk.bf16.mxu1 %vm3211_vm1, %v3209_v28  ;;  %2742 = vmatprep.mubr.msk.bf16.mxu0 %vm3211_vm1, %v3209_v28 }
 0x312   :  { %v910_v30 = vpop.permute.xlu1 %909  ;;  %v1161_v31 = vpop.permute.xlu0 %1160  ;;  %2710 = vmatprep.subr.bf16.mxu1 %v3209_v28  ;;  %2752 = vmatprep.subr.bf16.mxu0 %v3209_v28 }
 0x316   :  { %v1013_v32 = vpop.permute.xlu1 %1012  ;;  %v1263_v33 = vpop.permute.xlu0 %1262 }
 0x317   :  { %v1268_v35 = vsel %vm567_vm0, %v1263_v33, 0  ;;  %2707 = vmatmul.mubr.msk.bf16.vlgmr.msra.gmra.mrb[28].mxu1 %vm567_vm0, %v858_v25  ;;  %2743 = vmatmul.mubr.msk.bf16.vlgmr.msra.gmra.mrb[16].mxu0 %vm567_vm0, %v1161_v31  ;;  %v1018_v39 = vsel %vm567_vm0, %v1013_v32, 0 }
 0x318   :  { %2711 = vmatpush3.bf16.xpose.msra.mxu1 %v918_v34  ;;  %2753 = vmatpush3.bf16.xpose.msra.mxu0 %v1268_v35 }
 0x319   :  { %2712 = vmatprep.mubr.msk.bf16.mxu1 %vm3211_vm1, %v3209_v28  ;;  %2754 = vmatprep.mubr.msk.bf16.mxu0 %vm3211_vm1, %v3209_v28 }
 0x31a   :  { %v1113_v36 = vpop.permute.xlu1 %1112  ;;  %2722 = vmatprep.subr.bf16.mxu1 %v3209_v28  ;;  %2764 = vmatprep.subr.bf16.mxu0 %v3209_v28  ;;  %v1261_v37 = vpop.permute.xlu0 %1260 }
 0x31b   :  { %v1118_v43 = vsel %vm567_vm0, %v1113_v36, 0 }
 0x31e   :  { %v1011_v38 = vpop.permute.xlu1 %1010 }
 0x31f   :  { %2713 = vmatmul.mubr.msk.bf16.vlgmr.msra.gmra.mrb[32].mxu1 %vm567_vm0, %v910_v30  ;;  %2755 = vmatmul.mubr.msk.bf16.vlgmr.msra.gmra.mrb[20].mxu0 %vm567_vm0, %v1261_v37 }
 0x320   :  { %2723 = vmatpush3.bf16.xpose.msra.mxu1 %v1018_v39  ;;  %2724 = vmatprep.mubr.msk.bf16.mxu1 %vm3211_vm1, %v3209_v28 }
 0x321   :  { %2734 = vmatprep.subr.bf16.mxu1 %v3209_v28  ;;  %2766 = vmatprep.mubr.msk.bf16.mxu0 %vm3211_vm1, %v3209_v28 }
 0x322   :  { %v1111_v40 = vpop.permute.xlu1 %1110  ;;  %2765 = vmatpush3.bf16.msra.mxu0 %v1450_v50 }
 0x323   :  { %2776 = vmatprep.subr.bf16.mxu0 %v3209_v28 }
 0x326   :  { %v1213_v46 = vpop.permute.xlu1 %1212 }
 0x327   :  { %2725 = vmatmul.mubr.msk.bf16.vlgmr.msra.gmra.mrb[36].mxu1 %vm567_vm0, %v1011_v38  ;;  %v1218_v53 = vsel %vm567_vm0, %v1213_v46, 0 }
 0x328   :  { %2735 = vmatpush3.bf16.xpose.msra.mxu1 %v1118_v43  ;;  %2736 = vmatprep.mubr.msk.bf16.mxu1 %vm3211_vm1, %v3209_v28 }
 0x329   :  { %2746 = vmatprep.subr.bf16.mxu1 %v3209_v28 }
 0x32a   :  { %v1211_v52 = vpop.permute.xlu1 %1210 }
 0x32e   :  { %v1313_v54 = vpop.permute.xlu1 %1312 }
 0x32f   :  { %2737 = vmatmul.mubr.msk.bf16.vlgmr.msra.gmra.mrb[40].mxu1 %vm567_vm0, %v1111_v40  ;;  %v1318_v55 = vsel %vm567_vm0, %v1313_v54, 0 }
 0x330   :  { %2747 = vmatpush3.bf16.xpose.msra.mxu1 %v1218_v53  ;;  %2748 = vmatprep.mubr.msk.bf16.mxu1 %vm3211_vm1, %v3209_v28 }
 0x331   :  { %2758 = vmatprep.subr.bf16.mxu1 %v3209_v28 }
 0x332   :  { %v1311_v57 = vpop.permute.xlu1 %1310 }
 0x337   :  { %2749 = vmatmul.mubr.msk.bf16.vlgmr.msra.gmra.mrb[44].mxu1 %vm567_vm0, %v1211_v52 }
 0x338   :  { %2759 = vmatpush3.bf16.xpose.msra.mxu1 %v1318_v55  ;;  %2760 = vmatprep.mubr.msk.bf16.mxu1 %vm3211_vm1, %v3209_v28 }
 0x339   :  { %2770 = vmatprep.subr.bf16.mxu1 %v3209_v28 }
 0x33f   :  { %2761 = vmatmul.mubr.msk.bf16.vlgmr.msra.gmra.mrb[48].mxu1 %vm567_vm0, %v1311_v57 }
 0x340   :  { %2771 = vmatpush3.bf16.msra.mxu1 %v1496_v56  ;;  %2772 = vmatprep.mubr.msk.bf16.mxu1 %vm3211_vm1, %v3209_v28 }
 0x341   :  { %2782 = vmatprep.subr.bf16.mxu1 %v3209_v28 }
 0x364   :  { %v608_v58 = vpop.f32.mrb[4].mxu1 }
 0x365   :  { %v2672_v59 = vpop.f32.mrb[5].mxu1 }
 0x366   :  { %v611_v60 = vpop.f32.mrb[6].mxu1 }
 0x367   :  { %v2673_v61 = vpop.f32.mrb[7].mxu1 }
 0x36c   :  { %v3534_v62 = vpop.f32.mrb[8].mxu1 }
 0x36d   :  { %v2678_v63 = vpop.f32.mrb[9].mxu1 }
 0x36e   :  { %v657_v0 = vpop.f32.mrb[10].mxu1 }
 0x36f   :  { %v2679_v1 = vpop.f32.mrb[11].mxu1 }
 0x374   :  { %v3536_v2 = vpop.f32.mrb[12].mxu1 }
 0x375   :  { %v2684_v3 = vpop.f32.mrb[13].mxu1 }
 0x376   :  { %v703_v4 = vpop.f32.mrb[14].mxu1 }
 0x377   :  { %v2685_v5 = vpop.f32.mrb[15].mxu1 }
 0x37c   :  { %v3538_v6 = vpop.f32.mrb[16].mxu1 }
 0x37d   :  { %v2690_v7 = vpop.f32.mrb[17].mxu1 }
 0x37e   :  { %v749_v8 = vpop.f32.mrb[18].mxu1 }
 0x37f   :  { %v2691_v9 = vpop.f32.mrb[19].mxu1 }
 0x3d6   :  { %v798_v10 = vpop.f32.mrb[20].mxu1  ;;  %v1004_v11 = vpop.f32.mrb[8].mxu0 }
 0x3d7   :  { %v1360_v12 = vmax.f32 %v608_v58, %v798_v10  ;;  %v2696_v13 = vpop.f32.mrb[21].mxu1  ;;  %v2720_v14 = vpop.f32.mrb[9].mxu0 }
 0x3d8   :  { %v801_v15 = vpop.f32.mrb[22].mxu1  ;;  %v1007_v16 = vpop.f32.mrb[10].mxu0 }
 0x3d9   :  { %v1364_v17 = vmax.f32 %v1360_v12, %v1004_v11  ;;  %v2697_v18 = vpop.f32.mrb[23].mxu1  ;;  %v2721_v19 = vpop.f32.mrb[11].mxu0 }
 0x3e2   :  { %v3540_v20 = vpop.f32.mrb[24].mxu1  ;;  %v1104_v21 = vpop.f32.mrb[12].mxu0 }
 0x3e3   :  { %v1361_v22 = vmax.f32 %v3534_v62, %v3540_v20  ;;  %v2702_v23 = vpop.f32.mrb[25].mxu1  ;;  %v2732_v24 = vpop.f32.mrb[13].mxu0 }
 0x3e4   :  { %v853_v25 = vpop.f32.mrb[26].mxu1  ;;  %v1107_v26 = vpop.f32.mrb[14].mxu0 }
 0x3e5   :  { %v2703_v27 = vpop.f32.mrb[27].mxu1  ;;  %v2733_v29 = vpop.f32.mrb[15].mxu0 }
 0x3ea   :  { %v902_v30 = vpop.f32.mrb[28].mxu1  ;;  %v1204_v31 = vpop.f32.mrb[16].mxu0 }
 0x3eb   :  { %v1362_v32 = vmax.f32 %v3536_v2, %v902_v30  ;;  %v1368_v33 = vmax.f32 %v1364_v17, %v1204_v31  ;;  %v2708_v34 = vpop.f32.mrb[29].mxu1  ;;  %v2744_v35 = vpop.f32.mrb[17].mxu0 }
 0x3ec   :  { %v905_v36 = vpop.f32.mrb[30].mxu1  ;;  %v1207_v37 = vpop.f32.mrb[18].mxu0 }
 0x3ed   :  { %v1372_v38 = vsub.f32 %v608_v58, %v1368_v33  ;;  %v1384_v39 = vsub.f32 %v798_v10, %v1368_v33  ;;  %v1396_v40 = vsub.f32 %v1004_v11, %v1368_v33  ;;  %v1408_v41 = vsub.f32 %v1204_v31, %v1368_v33  ;;  %v2709_v42 = vpop.f32.mrb[31].mxu1  ;;  %v2745_v43 = vpop.f32.mrb[19].mxu0 }
 0x3ee   :  { %v1366_v44 = vmax.f32 %v1362_v32, %v1104_v21 }
 0x3ef   :  { %v1376_v45 = vmul.f32 1.442695, %v1372_v38  ;;  %v1388_v46 = vmul.f32 1.442695, %v1384_v39  ;;  %v1400_v47 = vmul.f32 1.442695, %v1396_v40 }
 0x3f0   :  { %v1412_v49 = vmul.f32 1.442695, %v1408_v41 }
 0x3f1   :  { %2966 = vpow2.f32 %v1376_v45 }
 0x3f2   :  { %2968 = vpow2.f32 %v1388_v46  ;;  %v3545_v50 = vpop.f32.mrb[32].mxu1  ;;  %v1304_v52 = vpop.f32.mrb[20].mxu0 }
 0x3f3   :  { %v1363_v53 = vmax.f32 %v3538_v6, %v3545_v50  ;;  %v1370_v54 = vmax.f32 %v1366_v44, %v1304_v52  ;;  %v2714_v55 = vpop.f32.mrb[33].mxu1  ;;  %v2756_v56 = vpop.f32.mrb[21].mxu0  ;;  %2970 = vpow2.f32 %v1400_v47 }
 0x3f4   :  { %v957_v57 = vpop.f32.mrb[34].mxu1  ;;  %v1307_v58 = vpop.f32.mrb[22].mxu0  ;;  %2972 = vpow2.f32 %v1412_v49 }
 0x3f5   :  { %v1374_v59 = vsub.f32 %v3536_v2, %v1370_v54  ;;  %v1386_v60 = vsub.f32 %v902_v30, %v1370_v54  ;;  %v1398_v61 = vsub.f32 %v1104_v21, %v1370_v54  ;;  %v1410_v63 = vsub.f32 %v1304_v52, %v1370_v54  ;;  %v2715_v0 = vpop.f32.mrb[35].mxu1  ;;  %v2757_v1 = vpop.f32.mrb[23].mxu0 }
 0x3f6   :  { %v1640_v0 = vpop.permute.xlu0 %1639 }
 0x3f7   :  { %v1380_v3 = vmul.f32 1.442695, %v1374_v59  ;;  %v1392_v4 = vmul.f32 1.442695, %v1386_v60  ;;  %v1404_v5 = vmul.f32 1.442695, %v1398_v61 }
 0x3f8   :  { %v1416_v7 = vmul.f32 1.442695, %v1410_v63 }
 0x3f9   :  { %2974 = vpow2.f32 %v1380_v3 }
 0x3fa   :  { %2976 = vpow2.f32 %v1392_v4  ;;  %v1054_v8 = vpop.f32.mrb[36].mxu1 }
 0x3fb   :  { %v2967_v9 = vpop.eup %2966  ;;  %v1365_v10 = vmax.f32 %v1361_v22, %v1054_v8  ;;  %v2726_v11 = vpop.f32.mrb[37].mxu1  ;;  %2978 = vpow2.f32 %v1404_v5 }
 0x3fc   :  { %v2969_v12 = vpop.eup %2968  ;;  %v1057_v13 = vpop.f32.mrb[38].mxu1  ;;  %2980 = vpow2.f32 %v1416_v7  ;;  %v1645_v11 = vsel %vm1448_vm2, %v1640_v0, 0 }
 0x3fd   :  { %v1420_v2 = vadd.f32 %v2969_v12, %v2967_v9  ;;  %v2727_v14 = vpop.f32.mrb[39].mxu1  ;;  %v2971_v15 = vpop.eup %2970 }
 0x3fe   :  { %v2973_v17 = vpop.eup %2972  ;;  %v1738_v14 = vpop.permute.xlu0 %1737 }
 0x3ff   :  { %v1424_v16 = vadd.f32 %v2971_v15, %v1420_v2 }
 0x401   :  { %v1428_v18 = vadd.f32 %v2973_v17, %v1424_v16 }
 0x402   :  { %v1154_v19 = vpop.f32.mrb[40].mxu1 }
 0x403   :  { %v2975_v21 = vpop.eup %2974  ;;  %2982 = vrcp.f32 %v1428_v18  ;;  %v1367_v23 = vmax.f32 %v1363_v53, %v1154_v19  ;;  %v2738_v24 = vpop.f32.mrb[41].mxu1  ;;  %v1743_v18 = vsel %vm1448_vm2, %v1738_v14, 0 }
 0x404   :  { %v2977_v25 = vpop.eup %2976  ;;  %v1157_v26 = vpop.f32.mrb[42].mxu1 }
 0x405   :  { %v1422_v27 = vadd.f32 %v2977_v25, %v2975_v21  ;;  %v2739_v22 = vpop.f32.mrb[43].mxu1  ;;  %v2979_v29 = vpop.eup %2978 }
 0x406   :  { %v2981_v31 = vpop.eup %2980 }
 0x407   :  { %v1426_v30 = vadd.f32 %v2979_v29, %v1422_v27 }
 0x409   :  { %v1430_v32 = vadd.f32 %v2981_v31, %v1426_v30 }
 0x40a   :  { %v1254_v33 = vpop.f32.mrb[44].mxu1 }
 0x40b   :  { %2984 = vrcp.f32 %v1430_v32  ;;  %v1369_v34 = vmax.f32 %v1365_v10, %v1254_v33  ;;  %v2750_v35 = vpop.f32.mrb[45].mxu1 }
 0x40c   :  { %v1257_v36 = vpop.f32.mrb[46].mxu1 }
 0x40d   :  { %v2983_v37 = vpop.eup %2982  ;;  %v1373_v38 = vsub.f32 %v3534_v62, %v1369_v34  ;;  %v1385_v39 = vsub.f32 %v3540_v20, %v1369_v34  ;;  %v1397_v40 = vsub.f32 %v1054_v8, %v1369_v34  ;;  %v1409_v41 = vsub.f32 %v1254_v33, %v1369_v34  ;;  %v2751_v42 = vpop.f32.mrb[47].mxu1 }
 0x40e   :  { %v1436_v43 = vmul.f32 %v2983_v37, %v2967_v9  ;;  %v1630_v44 = vmul.f32 %v2983_v37, %v2969_v12  ;;  %v3552_v45 = vmul.f32 %v2983_v37, %v2971_v15  ;;  %v3554_v46 = vmul.f32 %v2983_v37, %v2973_v17 }
 0x40f   :  { %v1378_v47 = vmul.f32 1.442695, %v1373_v38  ;;  %v1390_v49 = vmul.f32 1.442695, %v1385_v39  ;;  %v1402_v52 = vmul.f32 1.442695, %v1397_v40 }
 0x410   :  { %v1414_v53 = vmul.f32 1.442695, %v1409_v41  ;;  %v1440_v54 = vpack.c.bf16 %v1436_v43, %v1436_v43  ;;  %v1542_v62 = vsel %vm1448_vm2, %v3495_v48, 0  ;;  %v1634_v17 = vpack.c.bf16 %v1630_v44, %v1630_v44 }
 0x411   :  { %2986 = vpow2.f32 %v1378_v47  ;;  %v1838_v40 = vpack.c.bf16 %v3552_v45, %v3552_v45  ;;  %v1588_v41 = vsel %vm1448_vm2, %v3499_v51, 0  ;;  %v1689_v51 = vpop.permute.xlu1 %1688 }
 0x412   :  { %2988 = vpow2.f32 %v1390_v49  ;;  %2767 = vmatmul.mubr.msk.bf16.vlgmr.msra.gmra.mrb[24].mxu0 %vm1444_vm3, %v1440_v54  ;;  %v1354_v20 = vpop.f32.mrb[48].mxu1 }
 0x413   :  { %2990 = vpow2.f32 %v1402_v52  ;;  %2777 = vmatpush3.bf16.msra.mxu0 %v1542_v62  ;;  %v1371_v55 = vmax.f32 %v1367_v23, %v1354_v20  ;;  %v2762_v56 = vpop.f32.mrb[49].mxu1  ;;  %2778 = vmatprep.mubr.msk.bf16.mxu0 %vm3211_vm1, %v3209_v28  ;;  %v1694_v52 = vsel %vm1448_vm2, %v1689_v51, 0 }
 0x414   :  { %2992 = vpow2.f32 %v1414_v53  ;;  %v1357_v57 = vpop.f32.mrb[50].mxu1  ;;  %2788 = vmatprep.subr.bf16.mxu0 %v3209_v28  ;;  %v2038_v56 = vpack.c.bf16 %v3554_v46, %v3554_v46 }
 0x415   :  { %v2985_v58 = vpop.eup %2984  ;;  %v1375_v59 = vsub.f32 %v3538_v6, %v1371_v55  ;;  %v1387_v60 = vsub.f32 %v3545_v50, %v1371_v55  ;;  %v1399_v61 = vsub.f32 %v1154_v19, %v1371_v55  ;;  %v1411_v63 = vsub.f32 %v1354_v20, %v1371_v55  ;;  %v2763_v48 = vpop.f32.mrb[51].mxu1 }
 0x416   :  { %v1438_v1 = vmul.f32 %v2985_v58, %v2975_v21  ;;  %v1632_v3 = vmul.f32 %v2985_v58, %v2977_v25  ;;  %v3564_v4 = vmul.f32 %v2985_v58, %v2979_v29  ;;  %v3566_v5 = vmul.f32 %v2985_v58, %v2981_v31  ;;  %v1843_v25 = vpop.permute.xlu0 %1842  ;;  %v1787_v57 = vpop.permute.xlu1 %1786 }
 0x417   :  { %v1382_v7 = vmul.f32 1.442695, %v1375_v59  ;;  %v1394_v8 = vmul.f32 1.442695, %v1387_v60  ;;  %v1406_v9 = vmul.f32 1.442695, %v1399_v61 }
 0x418   :  { %v1442_v10 = vpack.c.bf16 %v1438_v1, %v1438_v1  ;;  %v1418_v6 = vmul.f32 1.442695, %v1411_v63  ;;  %v1636_v29 = vpack.c.bf16 %v1632_v3, %v1632_v3  ;;  %v1848_v30 = vsel %vm1448_vm2, %v1843_v25, 0 }
 0x419   :  { %2994 = vpow2.f32 %v1382_v7  ;;  %v1840_v62 = vpack.c.bf16 %v3564_v4, %v3564_v4  ;;  %v1792_v58 = vsel %vm1448_vm2, %v1787_v57, 0  ;;  %v2040_v60 = vpack.c.bf16 %v3566_v5, %v3566_v5 }
 0x41a   :  { %2996 = vpow2.f32 %v1394_v8  ;;  %2779 = vmatmul.mubr.msk.bf16.vlgmr.msra.gmra.mrb[28].mxu0 %vm1444_vm3, %v1442_v10  ;;  %v1939_v37 = vpop.permute.xlu0 %1938  ;;  %v1891_v61 = vpop.permute.xlu1 %1890 }
 0x41b   :  { %v2987_v50 = vpop.eup %2986  ;;  %2789 = vmatpush3.bf16.msra.mxu0 %v1645_v11  ;;  %2790 = vmatprep.mubr.msk.bf16.mxu0 %vm3211_vm1, %v3209_v28  ;;  %2998 = vpow2.f32 %v1406_v9  ;;  %v1944_v38 = vsel %vm1448_vm2, %v1939_v37, 0  ;;  %v1896_v63 = vsel %vm1448_vm2, %v1891_v61, 0 }
 0x41c   :  { %v2989_v12 = vpop.eup %2988  ;;  %2800 = vmatprep.subr.bf16.mxu0 %v3209_v28  ;;  %3000 = vpow2.f32 %v1418_v6 }
 0x41d   :  { %v2991_v13 = vpop.eup %2990  ;;  %v1421_v2 = vadd.f32 %v2989_v12, %v2987_v50 }
 0x41e   :  { %v2993_v15 = vpop.eup %2992  ;;  %v2043_v49 = vpop.permute.xlu0 %2042 }
 0x41f   :  { %v1425_v16 = vadd.f32 %v2991_v13, %v1421_v2  ;;  %v2048_v53 = vsel %vm1448_vm2, %v2043_v49, 0  ;;  %v1987_v0 = vpop.permute.xlu1 %1986 }
 0x420   :  { %v1992_v1 = vsel %vm1448_vm2, %v1987_v0, 0  ;;  %v2958_v0 = vld [vmem:[#allocation13 + $0x20] sm:$0xff]  }
 0x421   :  { %v1429_v19 = vadd.f32 %v2993_v15, %v1425_v16 }
 0x422   :  { %2791 = vmatmul.mubr.msk.bf16.vlgmr.msra.gmra.mrb[32].mxu0 %vm1444_vm3, %v1634_v17  ;;  %v2139_v20 = vpop.permute.xlu0 %2138 }
 0x423   :  { %v2995_v21 = vpop.eup %2994  ;;  %3002 = vrcp.f32 %v1429_v19  ;;  %2801 = vmatpush3.bf16.msra.mxu0 %v1743_v18  ;;  %2802 = vmatprep.mubr.msk.bf16.mxu0 %vm3211_vm1, %v3209_v28  ;;  %v2144_v59 = vsel %vm1448_vm2, %v2139_v20, 0  ;;  %v2091_v4 = vpop.permute.xlu1 %2090 }
 0x424   :  { %v2997_v23 = vpop.eup %2996  ;;  %2812 = vmatprep.subr.bf16.mxu0 %v3209_v28  ;;  %v2096_v5 = vsel %vm1448_vm2, %v2091_v4, 0 }
 0x425   :  { %v1423_v24 = vadd.f32 %v2997_v23, %v2995_v21  ;;  %v2999_v26 = vpop.eup %2998 }
 0x426   :  { %v3001_v22 = vpop.eup %3000 }
 0x427   :  { %v1427_v27 = vadd.f32 %v2999_v26, %v1423_v24  ;;  %v2187_v7 = vpop.permute.xlu1 %2186 }
 0x428   :  { %v2192_v9 = vsel %vm1448_vm2, %v2187_v7, 0  ;;  %v2959_v7 = vld [vmem:[#allocation13 + $0x28] sm:$0xff]  }
 0x429   :  { %v1431_v31 = vadd.f32 %v3001_v22, %v1427_v27 }
 0x42a   :  { %2803 = vmatmul.mubr.msk.bf16.vlgmr.msra.gmra.mrb[36].mxu0 %vm1444_vm3, %v1636_v29 }
 0x42b   :  { %3004 = vrcp.f32 %v1431_v31  ;;  %2813 = vmatpush3.bf16.msra.mxu0 %v1848_v30  ;;  %2814 = vmatprep.mubr.msk.bf16.mxu0 %vm3211_vm1, %v3209_v28 }
 0x42c   :  { %2824 = vmatprep.subr.bf16.mxu0 %v3209_v28 }
 0x42d   :  { %v3003_v32 = vpop.eup %3002 }
 0x42e   :  { %v1437_v33 = vmul.f32 %v3003_v32, %v2987_v50  ;;  %v1631_v34 = vmul.f32 %v3003_v32, %v2989_v12  ;;  %v1835_v35 = vmul.f32 %v3003_v32, %v2991_v13  ;;  %v3583_v36 = vmul.f32 %v3003_v32, %v2993_v15 }
 0x430   :  { %v1441_v39 = vpack.c.bf16 %v1437_v33, %v1437_v33  ;;  %v1635_v55 = vpack.c.bf16 %v1631_v34, %v1631_v34  ;;  %v1839_v48 = vpack.c.bf16 %v1835_v35, %v1835_v35  ;;  %v2039_v8 = vpack.c.bf16 %v3583_v36, %v3583_v36 }
 0x432   :  { %2773 = vmatmul.mubr.msk.bf16.vlgmr.msra.gmra.mrb[52].mxu1 %vm1444_vm3, %v1441_v39  ;;  %2815 = vmatmul.mubr.msk.bf16.vlgmr.msra.gmra.mrb[40].mxu0 %vm1444_vm3, %v1838_v40 }
 0x433   :  { %2783 = vmatpush3.bf16.msra.mxu1 %v1588_v41  ;;  %2825 = vmatpush3.bf16.msra.mxu0 %v1944_v38 }
 0x434   :  { %2784 = vmatprep.mubr.msk.bf16.mxu1 %vm3211_vm1, %v3209_v28  ;;  %2794 = vmatprep.subr.bf16.mxu1 %v3209_v28 }
 0x435   :  { %v3005_v42 = vpop.eup %3004  ;;  %2826 = vmatprep.mubr.msk.bf16.mxu0 %vm3211_vm1, %v3209_v28  ;;  %2836 = vmatprep.subr.bf16.mxu0 %v3209_v28 }
 0x436   :  { %v1439_v43 = vmul.f32 %v3005_v42, %v2995_v21  ;;  %v1633_v44 = vmul.f32 %v3005_v42, %v2997_v23  ;;  %v1837_v45 = vmul.f32 %v3005_v42, %v2999_v26  ;;  %v2037_v47 = vmul.f32 %v3005_v42, %v3001_v22 }
 0x438   :  { %v1443_v54 = vpack.c.bf16 %v1439_v43, %v1439_v43  ;;  %v1637_v46 = vpack.c.bf16 %v1633_v44, %v1633_v44  ;;  %v1841_v3 = vpack.c.bf16 %v1837_v45, %v1837_v45  ;;  %v2041_v10 = vpack.c.bf16 %v2037_v47, %v2037_v47  ;;  %v2954_v43 = vld [vmem:[#allocation13] sm:$0xff]  }
 0x43a   :  { %2785 = vmatmul.mubr.msk.bf16.vlgmr.msra.gmra.mrb[56].mxu1 %vm1444_vm3, %v1443_v54  ;;  %2827 = vmatmul.mubr.msk.bf16.vlgmr.msra.gmra.mrb[44].mxu0 %vm1444_vm3, %v1840_v62  ;;  %v2955_v54 = vld [vmem:[#allocation13 + $0x8] sm:$0xff]  }
 0x43b   :  { %2795 = vmatpush3.bf16.msra.mxu1 %v1694_v52  ;;  %2837 = vmatpush3.bf16.msra.mxu0 %v2048_v53 }
 0x43c   :  { %2796 = vmatprep.mubr.msk.bf16.mxu1 %vm3211_vm1, %v3209_v28  ;;  %2806 = vmatprep.subr.bf16.mxu1 %v3209_v28 }
 0x43d   :  { %2838 = vmatprep.mubr.msk.bf16.mxu0 %vm3211_vm1, %v3209_v28  ;;  %2848 = vmatprep.subr.bf16.mxu0 %v3209_v28 }
 0x442   :  { %2797 = vmatmul.mubr.msk.bf16.vlgmr.msra.gmra.mrb[60].mxu1 %vm1444_vm3, %v1635_v55  ;;  %2839 = vmatmul.mubr.msk.bf16.vlgmr.msra.gmra.mrb[48].mxu0 %vm1444_vm3, %v2038_v56  ;;  %v2956_v55 = vld [vmem:[#allocation13 + $0x10] sm:$0xff]  }
 0x443   :  { %2807 = vmatpush3.bf16.msra.mxu1 %v1792_v58  ;;  %2849 = vmatpush3.bf16.msra.mxu0 %v2144_v59 }
 0x444   :  { %2808 = vmatprep.mubr.msk.bf16.mxu1 %vm3211_vm1, %v3209_v28  ;;  %2818 = vmatprep.subr.bf16.mxu1 %v3209_v28 }
 0x445   :  { %2850 = vmatprep.mubr.msk.bf16.mxu0 %vm3211_vm1, %v3209_v28  ;;  %2860 = vmatprep.subr.bf16.mxu0 %v2954_v43 }
 0x44a   :  { %2809 = vmatmul.mubr.msk.bf16.vlgmr.msra.gmra.mrb[64].mxu1 %vm1444_vm3, %v1637_v46  ;;  %2851 = vmatmul.mubr.msk.bf16.vlgmr.msra.gmra.mrb[52].mxu0 %vm1444_vm3, %v2040_v60 }
 0x44b   :  { %2819 = vmatpush3.bf16.msra.mxu1 %v1896_v63  ;;  %2820 = vmatprep.mubr.msk.bf16.mxu1 %vm3211_vm1, %v3209_v28  ;;  %v2957_v63 = vld [vmem:[#allocation13 + $0x18] sm:$0xff]  }
 0x44c   :  { %2830 = vmatprep.subr.bf16.mxu1 %v3209_v28  ;;  %2861 = vmatpush3.bf16.msra.mxu0 %v2954_v43 }
 0x44d   :  { %2862 = vmatprep.subr.bf16.mxu0 %v2955_v54 }
 0x450   :  { %2863 = vmatpush3.bf16.msra.mxu0 %v2955_v54 }
 0x451   :  { %2864 = vmatprep.subr.bf16.mxu0 %v2956_v55 }
 0x452   :  { %2821 = vmatmul.mubr.msk.bf16.vlgmr.msra.gmra.mrb[68].mxu1 %vm1444_vm3, %v1839_v48 }
 0x453   :  { %2831 = vmatpush3.bf16.msra.mxu1 %v1992_v1  ;;  %2832 = vmatprep.mubr.msk.bf16.mxu1 %vm3211_vm1, %v3209_v28 }
 0x454   :  { %2842 = vmatprep.subr.bf16.mxu1 %v3209_v28  ;;  %2865 = vmatpush3.bf16.msra.mxu0 %v2956_v55 }
 0x455   :  { %2866 = vmatprep.subr.bf16.mxu0 %v2957_v63 }
 0x458   :  { %2867 = vmatpush3.bf16.msra.mxu0 %v2957_v63 }
 0x459   :  { %2868 = vmatprep.subr.bf16.mxu0 %v2958_v0 }
 0x45a   :  { %2833 = vmatmul.mubr.msk.bf16.vlgmr.msra.gmra.mrb[72].mxu1 %vm1444_vm3, %v1841_v3 }
 0x45b   :  { %2843 = vmatpush3.bf16.msra.mxu1 %v2096_v5  ;;  %2844 = vmatprep.mubr.msk.bf16.mxu1 %vm3211_vm1, %v3209_v28 }
 0x45c   :  { %2854 = vmatprep.subr.bf16.mxu1 %v3209_v28  ;;  %2869 = vmatpush3.bf16.msra.mxu0 %v2958_v0 }
 0x45d   :  { %2870 = vmatprep.subr.bf16.mxu0 %v2959_v7 }
 0x460   :  { %2871 = vmatpush3.bf16.msra.mxu0 %v2959_v7 }
 0x462   :  { %2845 = vmatmul.mubr.msk.bf16.vlgmr.msra.gmra.mrb[76].mxu1 %vm1444_vm3, %v2039_v8  ;;  %v2960_v8 = vld [vmem:[#allocation13 + $0x30] sm:$0xff]  }
 0x463   :  { %2855 = vmatpush3.bf16.msra.mxu1 %v2192_v9  ;;  %2856 = vmatprep.mubr.msk.bf16.mxu1 %vm3211_vm1, %v3209_v28 }
 0x464   :  { %2872 = vmatprep.subr.bf16.mxu0 %v2960_v8 }
 0x465   :  { %2873 = vmatpush3.bf16.msra.mxu0 %v2960_v8 }
 0x46a   :  { %2857 = vmatmul.mubr.msk.bf16.vlgmr.msra.gmra.mrb[80].mxu1 %vm1444_vm3, %v2041_v10 }
 0x4e5   :  { %v3646_v11 = vpop.f32.mrb[24].mxu0 }
 0x4e6   :  { %v2768_v6 = vpop.f32.mrb[25].mxu0 }
 0x4e7   :  { %v1489_v50 = vpop.f32.mrb[26].mxu0 }
 0x4e8   :  { %v2769_v12 = vpop.f32.mrb[27].mxu0 }
 0x4ed   :  { %v3648_v13 = vpop.f32.mrb[28].mxu0 }
 0x4ee   :  { %v2780_v2 = vpop.f32.mrb[29].mxu0 }
 0x4ef   :  { %v1581_v14 = vpop.f32.mrb[30].mxu0  ;;  %v2961_v2 = vld [vmem:[#allocation13 + $0x38] sm:$0xff]  }
 0x4f0   :  { %v2781_v15 = vpop.f32.mrb[31].mxu0  ;;  %2874 = vmatprep.subr.bf16.mxu0 %v2961_v2 }
 0x4f1   :  { %2875 = vmatpush3.bf16.msra.mxu0 %v2961_v2 }
 0x4f5   :  { %v1681_v16 = vpop.f32.mrb[32].mxu0 }
 0x4f6   :  { %v2792_v17 = vpop.f32.mrb[33].mxu0 }
 0x4f7   :  { %v1684_v18 = vpop.f32.mrb[34].mxu0 }
 0x4f8   :  { %v2793_v19 = vpop.f32.mrb[35].mxu0 }
 0x4fd   :  { %v1779_v21 = vpop.f32.mrb[36].mxu0 }
 0x4fe   :  { %v2804_v23 = vpop.f32.mrb[37].mxu0 }
 0x4ff   :  { %v1782_v28 = vpop.f32.mrb[38].mxu0 }
 0x500   :  { %v2805_v24 = vpop.f32.mrb[39].mxu0 }
 0x505   :  { %v3650_v25 = vpop.f32.mrb[52].mxu1  ;;  %v1884_v26 = vpop.f32.mrb[40].mxu0 }
 0x506   :  { %v2774_v27 = vpop.f32.mrb[53].mxu1  ;;  %v2816_v22 = vpop.f32.mrb[41].mxu0 }
 0x507   :  { %v1535_v29 = vpop.f32.mrb[54].mxu1  ;;  %v1887_v30 = vpop.f32.mrb[42].mxu0  ;;  %v3663_v27 = vld [vmem:[#allocation2 + $0x8] sm:$0xff] }
 0x508   :  { %v2775_v31 = vpop.f32.mrb[55].mxu1  ;;  %v2817_v32 = vpop.f32.mrb[43].mxu0 }
 0x50d   :  { %v3652_v33 = vpop.f32.mrb[56].mxu1  ;;  %v1980_v34 = vpop.f32.mrb[44].mxu0 }
 0x50e   :  { %v2786_v35 = vpop.f32.mrb[57].mxu1  ;;  %v2828_v36 = vpop.f32.mrb[45].mxu0 }
 0x50f   :  { %v1627_v37 = vpop.f32.mrb[58].mxu1  ;;  %v1983_v38 = vpop.f32.mrb[46].mxu0 }
 0x510   :  { %v2787_v39 = vpop.f32.mrb[59].mxu1  ;;  %v2829_v40 = vpop.f32.mrb[47].mxu0 }
 0x515   :  { %v1730_v41 = vpop.f32.mrb[60].mxu1  ;;  %v2084_v42 = vpop.f32.mrb[48].mxu0 }
 0x516   :  { %v2896_v44 = vpack.i.bf16 %v1730_v41, %v1681_v16  ;;  %v2798_v45 = vpop.f32.mrb[61].mxu1  ;;  %v2840_v47 = vpop.f32.mrb[49].mxu0 }
 0x517   :  { %v1733_v51 = vpop.f32.mrb[62].mxu1  ;;  %v2087_v49 = vpop.f32.mrb[50].mxu0 }
 0x518   :  { %v2799_v52 = vpop.f32.mrb[63].mxu1  ;;  %2897 = vrot.lane.b32.xlu0 %v2896_v44, %s3212_s4  ;;  %v2841_v53 = vpop.f32.mrb[51].mxu0 }
 0x51d   :  { %v1828_v62 = vpop.f32.mrb[64].mxu1  ;;  %v2180_v20 = vpop.f32.mrb[52].mxu0 }
 0x51e   :  { %v2901_v56 = vpack.i.bf16 %v1828_v62, %v1779_v21  ;;  %v2810_v57 = vpop.f32.mrb[65].mxu1  ;;  %v2852_v58 = vpop.f32.mrb[53].mxu0 }
 0x51f   :  { %v1831_v59 = vpop.f32.mrb[66].mxu1  ;;  %v2183_v46 = vpop.f32.mrb[54].mxu0 }
 0x520   :  { %v2811_v60 = vpop.f32.mrb[67].mxu1  ;;  %2902 = vrot.lane.b32.xlu1 %v2901_v56, %s3212_s4  ;;  %v2853_v61 = vpop.f32.mrb[55].mxu0 }
 0x525   :  { %v1932_v48 = vpop.f32.mrb[68].mxu1 }
 0x526   :  { %v2906_v1 = vpack.i.bf16 %v1932_v48, %v1884_v26  ;;  %v2822_v3 = vpop.f32.mrb[69].mxu1  ;;  %v3660_v26 = vld [vmem:[#allocation2] sm:$0xff] }
 0x527   :  { %v1935_v4 = vpop.f32.mrb[70].mxu1 }
 0x528   :  { %v2823_v5 = vpop.f32.mrb[71].mxu1  ;;  %2907 = vrot.lane.b32.xlu0 %v2906_v1, %s3199_s15 }
 0x52d   :  { %v2028_v9 = vpop.f32.mrb[72].mxu1 }
 0x52e   :  { %v2911_v10 = vpack.i.bf16 %v2028_v9, %v1980_v34  ;;  %v2834_v6 = vpop.f32.mrb[73].mxu1 }
 0x52f   :  { %v2031_v50 = vpop.f32.mrb[74].mxu1 }
 0x530   :  { %v2835_v12 = vpop.f32.mrb[75].mxu1  ;;  %2912 = vrot.lane.b32.xlu1 %v2911_v10, %s3199_s15  ;;  %v3010_v10 = vld [vmem:[#allocation2 + $0x10] sm:$0xff]  ;;  %s3213_s15 = smov [#allocation14]  }
 0x531   :  { %s2420_s25 = sshll.u32 %s3213_s15, 4  ;;  %s2421_s25 = int_to_ptr.vmem [resolvable:$true] %s2420_s25 }
 0x532   :  { %s3166_s26 = scalar_lea.vmem %s2421_s25, 512  ;;  %p3171_p1 = scmp.lt.s32.totalorder %s2421_s25, %s2421_s25 }
 0x533   :  { %p3167_p0 = scmp.ne.s32.totalorder %s2421_s25, %s3166_s26  ;;  %p3172_p2 = scmp.lt.s32.totalorder %s3166_s26, %s3166_s26 }
 0x535   :  { %v2132_v14 = vpop.f32.mrb[76].mxu1  ;;  %p3173_p3 = por %p3172_p2, %p3171_p1 }
 0x536   :  { %v2916_v15 = vpack.i.bf16 %v2132_v14, %v2084_v42  ;;  %v2846_v16 = vpop.f32.mrb[77].mxu1  ;;  %v3011_v14 = vld [vmem:[#allocation2 + $0x18] sm:$0xff] }
 0x537   :  { %v2135_v17 = vpop.f32.mrb[78].mxu1  ;;  %p3174_p4 = pnand %p3173_p3, %p3167_p0 }
 0x538   :  { %v2847_v18 = vpop.f32.mrb[79].mxu1  ;;  %2917 = vrot.lane.b32.xlu0 %v2916_v15, %s3210_s7 }
 0x53d   :  { %v2228_v19 = vpop.f32.mrb[80].mxu1 }
 0x53e   :  { %v2921_v21 = vpack.i.bf16 %v2228_v19, %v2180_v20  ;;  %v2858_v23 = vpop.f32.mrb[81].mxu1 }
 0x53f   :  { %v2231_v28 = vpop.f32.mrb[82].mxu1 }
 0x540   :  { %v2859_v24 = vpop.f32.mrb[83].mxu1  ;;  %2922 = vrot.lane.b32.xlu1 %v2921_v21, %s3210_s7 }
 0x557   :  { %130 = vadd.xlane.f32.xlu0 %v3660_v26 }
 0x564   :  { %132 = vadd.xlane.f32.xlu1 %v3663_v27 }
 0x58a   :  { %v2898_v22 = vpop.permute.xlu0 %2897 }
 0x58b   :  { %v2900_v30 = vunpack.i.h.bf16 %v2898_v22  ;;  %v2899_v31 = vunpack.i.l.bf16 %v2898_v22 }
 0x58d   :  { %v2283_v37 = vsel %vm567_vm0, %v3650_v25, %v2900_v30  ;;  %v2282_v38 = vsel %vm567_vm0, %v3646_v11, %v2899_v31 }
 0x592   :  { %v2903_v35 = vpop.permute.xlu1 %2902 }
 0x593   :  { %v2905_v51 = vunpack.i.h.bf16 %v2903_v35  ;;  %v2904_v49 = vunpack.i.l.bf16 %v2903_v35 }
 0x595   :  { %v2285_v11 = vsel %vm567_vm0, %v3652_v33, %v2905_v51  ;;  %v2284_v54 = vsel %vm567_vm0, %v3648_v13, %v2904_v49 }
 0x59a   :  { %v2908_v29 = vpop.permute.xlu0 %2907 }
 0x59b   :  { %v2910_v32 = vunpack.i.h.bf16 %v2908_v29  ;;  %v2909_v34 = vunpack.i.l.bf16 %v2908_v29 }
 0x59d   :  { %v2287_v41 = vsel %vm2286_vm4, %v2282_v38, %v2909_v34  ;;  %v2288_v42 = vsel %vm2286_vm4, %v2283_v37, %v2910_v32 }
 0x5a2   :  { %v2913_v43 = vpop.permute.xlu1 %2912 }
 0x5a3   :  { %v2915_v52 = vunpack.i.h.bf16 %v2913_v43  ;;  %v2914_v53 = vunpack.i.l.bf16 %v2913_v43 }
 0x5a5   :  { %v2290_v55 = vsel %vm2286_vm4, %v2285_v11, %v2915_v52  ;;  %v2289_v56 = vsel %vm2286_vm4, %v2284_v54, %v2914_v53 }
 0x5aa   :  { %v2918_v36 = vpop.permute.xlu0 %2917 }
 0x5ab   :  { %v2920_v39 = vunpack.i.h.bf16 %v2918_v36  ;;  %v2919_v40 = vunpack.i.l.bf16 %v2918_v36 }
 0x5ad   :  { %v2292_v44 = vsel %vm2291_vm5, %v2287_v41, %v2919_v40  ;;  %v2293_v45 = vsel %vm2291_vm5, %v2288_v42, %v2920_v39 }
 0x5ae   :  { %v2296_v47 = vpack.c.bf16 %v2293_v45, %v2292_v44 }
 0x5b0   :  { %2876 = vmatprep.mubr.bf16.mxu0 %v2296_v47 }
 0x5b2   :  { %v2923_v25 = vpop.permute.xlu1 %2922 }
 0x5b3   :  { %v2925_v62 = vunpack.i.h.bf16 %v2923_v25  ;;  %v2924_v20 = vunpack.i.l.bf16 %v2923_v25 }
 0x5b5   :  { %v2295_v57 = vsel %vm2291_vm5, %v2290_v55, %v2925_v62  ;;  %v2294_v58 = vsel %vm2291_vm5, %v2289_v56, %v2924_v20 }
 0x5b6   :  { %v2297_v59 = vpack.c.bf16 %v2295_v57, %v2294_v58 }
 0x5b8   :  { %2877 = vmatmul.mubr.bf16.vlgmr.msra.gmra.mrb[56].mxu0 %v2297_v59 }
 0x5e4   :  { %v131_v46 = vpop.xlane.xlu0 %130 }
 0x5e5   :  { %v139_v60 = vmul.f32 0.0078125, %v131_v46 }
 0x5e7   :  { %v143_v61 = vsub.f32 %v3660_v26, %v139_v60 }
 0x5e9   :  { %v147_v33 = vmul.f32 %v143_v61, %v143_v61 }
 0x5eb   :  { %151 = vadd.xlane.f32.xlu0 %v147_v33 }
 0x5f1   :  { %v133_v63 = vpop.xlane.xlu1 %132 }
 0x5f2   :  { %v140_v13 = vmul.f32 0.0078125, %v133_v63 }
 0x5f4   :  { %v144_v48 = vsub.f32 %v3663_v27, %v140_v13 }
 0x5f6   :  { %v148_v0 = vmul.f32 %v144_v48, %v144_v48 }
 0x5f8   :  { %153 = vadd.xlane.f32.xlu0 %v148_v0 }
 0x678   :  { %v152_v1 = vpop.xlane.xlu0 %151 }
 0x679   :  { %v159_v3 = vmul.f32 0.0078125, %v152_v1 }
 0x67b   :  { %v163_v4 = vadd.f32 1e-05, %v159_v3 }
 0x67d   :  { %3006 = vrsqrt.f32 %v163_v4 }
 0x685   :  { %v154_v5 = vpop.xlane.xlu0 %153 }
 0x686   :  { %v160_v7 = vmul.f32 0.0078125, %v154_v5 }
 0x687   :  { %v3007_v18 = vpop.eup %3006 }
 0x688   :  { %v164_v8 = vadd.f32 1e-05, %v160_v7 }
 0x68a   :  { %3008 = vrsqrt.f32 %v164_v8 }
 0x68b   :  { %v2878_v9 = vpop.f32.mrb[56].mxu0 }
 0x68c   :  { %v2405_v6 = vadd.f32 %v3010_v10, %v2878_v9  ;;  %v2396_v50 = vpop.f32.mrb[57].mxu0 }
 0x68d   :  { %v2397_v12 = vadd.f32 %v2396_v50, %v3660_v26  ;;  %v2879_v2 = vpop.f32.mrb[58].mxu0 }
 0x68e   :  { %2413 = vst [vmem:[#allocation14 + $0x10] sm:$0xff] %v2405_v6  ;;  %v2408_v15 = vadd.f32 %v3011_v14, %v2879_v2  ;;  %v2399_v16 = vpop.f32.mrb[59].mxu0 }
 0x68f   :  { %2411 = vst [vmem:[#allocation14] sm:$0xff] %v2397_v12  ;;  %v2400_v17 = vadd.f32 %v2399_v16, %v3663_v27 }
 0x690   :  { %2414 = vst [vmem:[#allocation14 + $0x18] sm:$0xff] %v2408_v15 }
 0x691   :  { %2412 = vst [vmem:[#allocation14 + $0x8] sm:$0xff] %v2400_v17 }
 0x692   :  { %3177 = shalt.err (!%p3174_p4)
}
 0x693   :  { %s3178_s30 = scalar_lea.hbm %s3709_s8, 512 }
 0x694   :  { %p3179_p5 = scmp.ne.s32.totalorder %s3709_s8, %s3178_s30  ;;  %p3182_p6 = scmp.lt.u32.totalorder %s3178_s30, %s3709_s8 }
 0x696   :  { %p3184_p7 = pnand %p3182_p6, %p3179_p5 }
 0x698   :  { %3187 = shalt.err (!%p3184_p7)
}
 0x699   :  { %2426 = dma.vmem_to_hbm [thread:$0]  %s2421_s25, 512, %s3709_s8, [#allocation4], %s3204_s6, %s3204_s6, %s3205_s22   ;;  %v3009_v19 = vpop.eup %3008  ;;  %v171_v21 = vmul.f32 %v3007_v18, %v143_v61 }
 0x69a   :  { %v172_v23 = vmul.f32 %v3009_v19, %v144_v48 }
 0x69c   :  { %v175_v28 = vpack.c.bf16 %v172_v23, %v171_v21 }
 0x69e   :  { %2624 = vmatprep.mubr.bf16.mxu0 %v175_v28 }
 0x69f   :  { %3196 = dma.done.wait [#allocation4], 512  }
 0x6a0   :  { %3197 = vsyncadd [#allocation4], 4294966784 }
 0x6a1   :  { %2430 = vsyncpa [#allocation3], 1 }
 0x6a2   :  { %2431 = vsyncpa [#allocation6], 1 }
 0x6a3   :  { %2432 = vsyncpa [#allocation9], 1 }
 0x6a4   :  { %2433 = vsyncpa [#allocation12], 1 }
 0x6a5   :  { %2434 = vsyncpa [#allocation4], 1 }

</bundles_post_ra>
